<compile_context>
chip_gen: v5e
topology: v5e:2x2
jax: 0.10.0
libtpu: 0.0.40
codegen_flags: <defaults>
</compile_context>

<pallas_src>
import functools

import jax
import jax.numpy as jnp
from jax import lax
from jax.experimental import pallas as pl
from jax.experimental.pallas import tpu as pltpu


def _round_up(x, m):
    return (x + m - 1) // m * m


def _inv_block_kernel(mask_ref, x_ref, wF_ref, wHG_ref, y_ref, s_ref, col_ref,
                      *, C1, C2, H, W, Kpad, clamp, b_tile):
    """Processes `b_tile` batch elements per grid step.

    mask_ref : (9, HW)          f32 VMEM, constant across steps (boundary masks)
    x_ref    : (b_tile, C, HW)  input block
    wF_ref   : (Mpad, Kpad)     im2col weights of F   (bias folded, zero padded)
    wHG_ref  : (Mpad, Kpad)     H stacked on G        (biases folded, zero padded)
    y_ref    : (b_tile, C, HW)
    s_ref    : (b_tile, C2, HW)
    col_ref  : (b_tile, Kpad, HW) VMEM scratch, shared im2col buffer
    """
    HW = H * W
    offs = [di * W + dj for di in (-1, 0, 1) for dj in (-1, 0, 1)]

    masks = mask_ref[...]                         # (9, HW), loaded once
    x = x_ref[...].astype(jnp.float32)            # (b_tile, C, HW)
    x1 = x[:, :C1, :]
    x2 = x[:, C1:, :]

    def build_im2col(src, cin):
        # One XLU roll per tap over the whole (b_tile, cin, HW) stack; each tap
        # is written straight into VMEM scratch so only one is live at a time.
        for t, off in enumerate(offs):
            if off == 0:
                tap = src
            else:
                tap = pltpu.roll(src, (-off) % HW, 2) * masks[t:t + 1, :]
            col_ref[:, t * cin:(t + 1) * cin, :] = tap
        # Bias/padding rows: weight column 9*cin holds the bias, later columns
        # are zero, so filling all remaining rows with ones is correct.
        col_ref[:, 9 * cin:Kpad, :] = jnp.ones(
            (b_tile, Kpad - 9 * cin, HW), jnp.float32)

    # ---------------- y1 = x1 + F(x2) -----------------------------------------
    build_im2col(x2, C2)
    wF = wF_ref[...]                              # (Mpad, Kpad)
    y1 = x1 + jnp.stack(
        [jnp.dot(wF, col_ref[b], preferred_element_type=jnp.float32)[:C1, :]
         for b in range(b_tile)], axis=0)         # (b_tile, C1, HW)
    y_ref[:, :C1, :] = y1.astype(y_ref.dtype)     # lane-dense direct store

    # ---------------- fused H & G over a shared y1 im2col ----------------------
    build_im2col(y1, C1)
    wHG = wHG_ref[...]                            # (Mpad, Kpad)
    for b in range(b_tile):
        hg = jnp.dot(wHG, col_ref[b], preferred_element_type=jnp.float32)
        s = clamp * jnp.tanh(0.5 * hg[:C2, :])    # == clamp * (2*sigmoid(h) - 1)
        y_ref[b, C1:, :] = (x2[b] * jnp.exp(s) + hg[C2:2 * C2, :]).astype(y_ref.dtype)
        s_ref[b] = s.astype(s_ref.dtype)


def inv_block_exp_forward(x, params, channel_split_num, clamp=1.0, b_tile=None):
    """x: (N, C, H, W) float32, NCHW.  Returns (y, s), both NCHW."""
    N, C, H, W = x.shape
    C1 = channel_split_num
    C2 = C - C1
    HW = H * W
    assert HW % 128 == 0, "H*W must be a multiple of 128 for lane-dense stores"

    if b_tile is None:
        # Pack several batch elements per grid step so rolls / VPU ops work on
        # fuller vregs and the ~0.35us/step grid overhead is amortized.
        b_tile = min(N, max(1, 8 // max(1, C)))
    while N % b_tile:
        b_tile -= 1

    Kpad = _round_up(9 * max(C1, C2) + 1, 8)      # im2col rows (+1 bias row)
    Mpad = _round_up(max(C1, 2 * C2), 8)          # padded output channels

    wF, bF = params["F"]   # (C1, C2, 3, 3), (C1,)
    wG, bG = params["G"]   # (C2, C1, 3, 3), (C2,)
    wH, bH = params["H"]   # (C2, C1, 3, 3), (C2,)

    def pack(w, b):
        # (Cout, Cin, 3, 3) -> (Cout, Kpad) with column order k = (kh*3+kw)*Cin + ci,
        # bias at column 9*Cin, zeros afterwards.
        cout, cin = w.shape[0], w.shape[1]
        w_mat = jnp.transpose(w, (0, 2, 3, 1)).reshape(cout, 9 * cin)
        pad = jnp.zeros((cout, Kpad - 9 * cin - 1), jnp.float32)
        return jnp.concatenate(
            [w_mat.astype(jnp.float32), b.astype(jnp.float32)[:, None], pad], axis=1)

    def pad_rows(m):
        return jnp.concatenate(
            [m, jnp.zeros((Mpad - m.shape[0], Kpad), jnp.float32)], axis=0)

    wF_aug = pad_rows(pack(wF, bF))                                    # (Mpad, Kpad)
    wHG_aug = pad_rows(jnp.concatenate([pack(wH, bH), pack(wG, bG)], axis=0))

    # 3x3 boundary masks, computed once (hoisted out of the grid loop).
    lane = jnp.arange(HW, dtype=jnp.int32)
    row, col = lane // W, lane % W
    masks = jnp.stack(
        [((row + di >= 0) & (row + di < H) & (col + dj >= 0) & (col + dj < W)
          ).astype(jnp.float32)
         for di in (-1, 0, 1) for dj in (-1, 0, 1)], axis=0)           # (9, HW)

    x_flat = x.reshape(N, C, HW)                  # free lane-dense view

    kernel = functools.partial(_inv_block_kernel, C1=C1, C2=C2, H=H, W=W,
                               Kpad=Kpad, clamp=float(clamp), b_tile=b_tile)

    flops = 2 * N * HW * 9 * 3 * C1 * C2 + 6 * N * C2 * HW
    transcendentals = 2 * N * C2 * HW
    bytes_accessed = 4 * (int(x_flat.size) + N * C * HW + N * C2 * HW
                          + int(masks.size) + int(wF_aug.size) + int(wHG_aug.size))

    y, s = pl.pallas_call(
        kernel,
        out_shape=(
            jax.ShapeDtypeStruct((N, C, HW), x.dtype),
            jax.ShapeDtypeStruct((N, C2, HW), jnp.float32),
        ),
        grid=(N // b_tile,),
        in_specs=[
            pl.BlockSpec((9, HW), lambda i: (0, 0)),             # masks (resident)
            pl.BlockSpec((b_tile, C, HW), lambda i: (i, 0, 0)),  # x batch tile
            pl.BlockSpec((Mpad, Kpad), lambda i: (0, 0)),        # F weights (resident)
            pl.BlockSpec((Mpad, Kpad), lambda i: (0, 0)),        # H|G weights (resident)
        ],
        out_specs=(
            pl.BlockSpec((b_tile, C, HW), lambda i: (i, 0, 0)),
            pl.BlockSpec((b_tile, C2, HW), lambda i: (i, 0, 0)),
        ),
        scratch_shapes=[pltpu.VMEM((b_tile, Kpad, HW), jnp.float32)],
        compiler_params=pltpu.CompilerParams(
            dimension_semantics=("parallel",)),                  # shard batch tiles
        cost_estimate=pl.CostEstimate(flops=flops,
                                      transcendentals=transcendentals,
                                      bytes_accessed=bytes_accessed),
    )(masks, x_flat, wF_aug, wHG_aug)

    return y.reshape(N, C, H, W), s.reshape(N, C2, H, W)


# ---------------- pure-JAX reference (for correctness check) ----------------

def _conv3x3_ref(x, w, b):
    y = lax.conv_general_dilated(
        x, w, window_strides=(1, 1), padding="SAME",
        dimension_numbers=("NCHW", "OIHW", "NCHW"))
    return y + b.reshape(1, -1, 1, 1)


def inv_block_exp_ref(x, params, channel_split_num, clamp=1.0):
    C1 = channel_split_num
    x1, x2 = x[:, :C1], x[:, C1:]
    wF, bF = params["F"]
    wG, bG = params["G"]
    wH, bH = params["H"]
    y1 = x1 + _conv3x3_ref(x2, wF, bF)
    s = clamp * (jax.nn.sigmoid(_conv3x3_ref(y1, wH, bH)) * 2.0 - 1.0)
    y2 = x2 * jnp.exp(s) + _conv3x3_ref(y1, wG, bG)
    return jnp.concatenate([y1, y2], axis=1), s


# ------------------------------------ main -----------------------------------

if __name__ == "__main__":
    key = jax.random.PRNGKey(0)
    N, C, H, W = 2, 4, 16, 16
    channel_split_num = 2
    C1 = channel_split_num
    C2 = C - C1
    clamp = 1.0

    k_x, k_wf, k_bf, k_wg, k_bg, k_wh, k_bh = jax.random.split(key, 7)
    x = jax.random.normal(k_x, (N, C, H, W), dtype=jnp.float32)

    def init_conv(kw, kb, cout, cin):
        fan_in = cin * 9
        w = jax.random.normal(kw, (cout, cin, 3, 3), jnp.float32) / jnp.sqrt(fan_in)
        b = 0.1 * jax.random.normal(kb, (cout,), jnp.float32)
        return w, b

    params = {
        "F": init_conv(k_wf, k_bf, C1, C2),
        "G": init_conv(k_wg, k_bg, C2, C1),
        "H": init_conv(k_wh, k_bh, C2, C1),
    }

    y, s = inv_block_exp_forward(x, params, channel_split_num, clamp)
    y = jax.block_until_ready(y)
    s = jax.block_until_ready(s)

    y_ref, s_ref = inv_block_exp_ref(x, params, channel_split_num, clamp)

    assert jnp.allclose(y, y_ref, atol=1e-4, rtol=1e-4), "output mismatch"
    assert jnp.allclose(s, s_ref, atol=1e-4, rtol=1e-4), "s mismatch"

    # jacobian() equivalent (rev=False): sum(s) / batch
    _jac = jnp.sum(s) / x.shape[0]
    jax.block_until_ready(_jac)

    print("KERNEL_OK")
</pallas_src>

<mosaic_0001>
module attributes {stable_mosaic.version = 11 : i64} {
  func.func @_inv_block_kernel(%arg0: i32, %arg1: memref<9x256xf32, #tpu.memory_space<vmem>>, %arg2: memref<2x4x256xf32, #tpu.memory_space<vmem>>, %arg3: memref<8x24xf32, #tpu.memory_space<vmem>>, %arg4: memref<8x24xf32, #tpu.memory_space<vmem>>, %arg5: memref<2x4x256xf32, #tpu.memory_space<vmem>>, %arg6: memref<2x2x256xf32, #tpu.memory_space<vmem>>, %arg7: memref<2x24x256xf32, #tpu.memory_space<vmem>>) attributes {dimension_semantics = [#tpu.dimension_semantics<parallel>], iteration_bounds = array<i64: 1>, scalar_prefetch = 0 : i64, scratch_operands = 1 : i64, tpu.core_type = #tpu.core_type<tc>, window_params = [{pipeline_mode = #tpu.pipeline_mode<synchronous>, transform_indices = @transform_0, window_bounds = array<i64: 9, 256>}, {transform_indices = @transform_1, window_bounds = array<i64: 2, 4, 256>}, {pipeline_mode = #tpu.pipeline_mode<synchronous>, transform_indices = @transform_2, window_bounds = array<i64: 8, 24>}, {pipeline_mode = #tpu.pipeline_mode<synchronous>, transform_indices = @transform_3, window_bounds = array<i64: 8, 24>}, {transform_indices = @transform_4, window_bounds = array<i64: 2, 4, 256>}, {transform_indices = @transform_5, window_bounds = array<i64: 2, 2, 256>}]} {
    %c0 = arith.constant 0 : index
    %c0_0 = arith.constant 0 : index
    %0 = vector.load %arg1[%c0, %c0_0] : memref<9x256xf32, #tpu.memory_space<vmem>>, vector<9x256xf32>
    %c0_1 = arith.constant 0 : index
    %c0_2 = arith.constant 0 : index
    %c0_3 = arith.constant 0 : index
    %1 = vector.load %arg2[%c0_1, %c0_2, %c0_3] : memref<2x4x256xf32, #tpu.memory_space<vmem>>, vector<2x4x256xf32>
    %2 = vector.extract_strided_slice %1 {offsets = [0, 0, 0], sizes = [2, 2, 256], strides = [1, 1, 1]} : vector<2x4x256xf32> to vector<2x2x256xf32>
    %3 = vector.extract_strided_slice %1 {offsets = [0, 2, 0], sizes = [2, 2, 256], strides = [1, 1, 1]} : vector<2x4x256xf32> to vector<2x2x256xf32>
    %c17_i32 = arith.constant 17 : i32
    %4 = tpu.dynamic_rotate %3 by %c17_i32 dim 2 : vector<2x2x256xf32>, i32 -> vector<2x2x256xf32>
    %5 = vector.extract_strided_slice %0 {offsets = [0, 0], sizes = [1, 256], strides = [1, 1]} : vector<9x256xf32> to vector<1x256xf32>
    %6 = vector.shape_cast %5 : vector<1x256xf32> to vector<1x1x256xf32>
    %7 = vector.broadcast %6 : vector<1x1x256xf32> to vector<2x2x256xf32>
    %8 = arith.mulf %4, %7 : vector<2x2x256xf32>
    %c0_4 = arith.constant 0 : index
    %c0_5 = arith.constant 0 : index
    %c0_6 = arith.constant 0 : index
    %9 = vector.load %arg7[%c0_4, %c0_5, %c0_6] : memref<2x24x256xf32, #tpu.memory_space<vmem>>, vector<2x2x256xf32>
    tpu.vector_store %arg7[%c0_4, %c0_5, %c0_6], %8 {strides = array<i32>} : memref<2x24x256xf32, #tpu.memory_space<vmem>>, vector<2x2x256xf32>,
    %c16_i32 = arith.constant 16 : i32
    %10 = tpu.dynamic_rotate %3 by %c16_i32 dim 2 : vector<2x2x256xf32>, i32 -> vector<2x2x256xf32>
    %11 = vector.extract_strided_slice %0 {offsets = [1, 0], sizes = [1, 256], strides = [1, 1]} : vector<9x256xf32> to vector<1x256xf32>
    %12 = vector.shape_cast %11 : vector<1x256xf32> to vector<1x1x256xf32>
    %13 = vector.broadcast %12 : vector<1x1x256xf32> to vector<2x2x256xf32>
    %14 = arith.mulf %10, %13 : vector<2x2x256xf32>
    %c0_7 = arith.constant 0 : index
    %c2 = arith.constant 2 : index
    %c0_8 = arith.constant 0 : index
    %15 = vector.load %arg7[%c0_7, %c2, %c0_8] : memref<2x24x256xf32, #tpu.memory_space<vmem>>, vector<2x2x256xf32>
    tpu.vector_store %arg7[%c0_7, %c2, %c0_8], %14 {strides = array<i32>} : memref<2x24x256xf32, #tpu.memory_space<vmem>>, vector<2x2x256xf32>,
    %c15_i32 = arith.constant 15 : i32
    %16 = tpu.dynamic_rotate %3 by %c15_i32 dim 2 : vector<2x2x256xf32>, i32 -> vector<2x2x256xf32>
    %17 = vector.extract_strided_slice %0 {offsets = [2, 0], sizes = [1, 256], strides = [1, 1]} : vector<9x256xf32> to vector<1x256xf32>
    %18 = vector.shape_cast %17 : vector<1x256xf32> to vector<1x1x256xf32>
    %19 = vector.broadcast %18 : vector<1x1x256xf32> to vector<2x2x256xf32>
    %20 = arith.mulf %16, %19 : vector<2x2x256xf32>
    %c0_9 = arith.constant 0 : index
    %c4 = arith.constant 4 : index
    %c0_10 = arith.constant 0 : index
    %21 = vector.load %arg7[%c0_9, %c4, %c0_10] : memref<2x24x256xf32, #tpu.memory_space<vmem>>, vector<2x2x256xf32>
    tpu.vector_store %arg7[%c0_9, %c4, %c0_10], %20 {strides = array<i32>} : memref<2x24x256xf32, #tpu.memory_space<vmem>>, vector<2x2x256xf32>,
    %c1_i32 = arith.constant 1 : i32
    %22 = tpu.dynamic_rotate %3 by %c1_i32 dim 2 : vector<2x2x256xf32>, i32 -> vector<2x2x256xf32>
    %23 = vector.extract_strided_slice %0 {offsets = [3, 0], sizes = [1, 256], strides = [1, 1]} : vector<9x256xf32> to vector<1x256xf32>
    %24 = vector.shape_cast %23 : vector<1x256xf32> to vector<1x1x256xf32>
    %25 = vector.broadcast %24 : vector<1x1x256xf32> to vector<2x2x256xf32>
    %26 = arith.mulf %22, %25 : vector<2x2x256xf32>
    %c0_11 = arith.constant 0 : index
    %c6 = arith.constant 6 : index
    %c0_12 = arith.constant 0 : index
    %27 = vector.load %arg7[%c0_11, %c6, %c0_12] : memref<2x24x256xf32, #tpu.memory_space<vmem>>, vector<2x2x256xf32>
    tpu.vector_store %arg7[%c0_11, %c6, %c0_12], %26 {strides = array<i32>} : memref<2x24x256xf32, #tpu.memory_space<vmem>>, vector<2x2x256xf32>,
    %c0_13 = arith.constant 0 : index
    %c8 = arith.constant 8 : index
    %c0_14 = arith.constant 0 : index
    %28 = vector.load %arg7[%c0_13, %c8, %c0_14] : memref<2x24x256xf32, #tpu.memory_space<vmem>>, vector<2x2x256xf32>
    tpu.vector_store %arg7[%c0_13, %c8, %c0_14], %3 {strides = array<i32>} : memref<2x24x256xf32, #tpu.memory_space<vmem>>, vector<2x2x256xf32>,
    %c255_i32 = arith.constant 255 : i32
    %29 = tpu.dynamic_rotate %3 by %c255_i32 dim 2 : vector<2x2x256xf32>, i32 -> vector<2x2x256xf32>
    %30 = vector.extract_strided_slice %0 {offsets = [5, 0], sizes = [1, 256], strides = [1, 1]} : vector<9x256xf32> to vector<1x256xf32>
    %31 = vector.shape_cast %30 : vector<1x256xf32> to vector<1x1x256xf32>
    %32 = vector.broadcast %31 : vector<1x1x256xf32> to vector<2x2x256xf32>
    %33 = arith.mulf %29, %32 : vector<2x2x256xf32>
    %c0_15 = arith.constant 0 : index
    %c10 = arith.constant 10 : index
    %c0_16 = arith.constant 0 : index
    %34 = vector.load %arg7[%c0_15, %c10, %c0_16] : memref<2x24x256xf32, #tpu.memory_space<vmem>>, vector<2x2x256xf32>
    tpu.vector_store %arg7[%c0_15, %c10, %c0_16], %33 {strides = array<i32>} : memref<2x24x256xf32, #tpu.memory_space<vmem>>, vector<2x2x256xf32>,
    %c241_i32 = arith.constant 241 : i32
    %35 = tpu.dynamic_rotate %3 by %c241_i32 dim 2 : vector<2x2x256xf32>, i32 -> vector<2x2x256xf32>
    %36 = vector.extract_strided_slice %0 {offsets = [6, 0], sizes = [1, 256], strides = [1, 1]} : vector<9x256xf32> to vector<1x256xf32>
    %37 = vector.shape_cast %36 : vector<1x256xf32> to vector<1x1x256xf32>
    %38 = vector.broadcast %37 : vector<1x1x256xf32> to vector<2x2x256xf32>
    %39 = arith.mulf %35, %38 : vector<2x2x256xf32>
    %c0_17 = arith.constant 0 : index
    %c12 = arith.constant 12 : index
    %c0_18 = arith.constant 0 : index
    %40 = vector.load %arg7[%c0_17, %c12, %c0_18] : memref<2x24x256xf32, #tpu.memory_space<vmem>>, vector<2x2x256xf32>
    tpu.vector_store %arg7[%c0_17, %c12, %c0_18], %39 {strides = array<i32>} : memref<2x24x256xf32, #tpu.memory_space<vmem>>, vector<2x2x256xf32>,
    %c240_i32 = arith.constant 240 : i32
    %41 = tpu.dynamic_rotate %3 by %c240_i32 dim 2 : vector<2x2x256xf32>, i32 -> vector<2x2x256xf32>
    %42 = vector.extract_strided_slice %0 {offsets = [7, 0], sizes = [1, 256], strides = [1, 1]} : vector<9x256xf32> to vector<1x256xf32>
    %43 = vector.shape_cast %42 : vector<1x256xf32> to vector<1x1x256xf32>
    %44 = vector.broadcast %43 : vector<1x1x256xf32> to vector<2x2x256xf32>
    %45 = arith.mulf %41, %44 : vector<2x2x256xf32>
    %c0_19 = arith.constant 0 : index
    %c14 = arith.constant 14 : index
    %c0_20 = arith.constant 0 : index
    %46 = vector.load %arg7[%c0_19, %c14, %c0_20] : memref<2x24x256xf32, #tpu.memory_space<vmem>>, vector<2x2x256xf32>
    tpu.vector_store %arg7[%c0_19, %c14, %c0_20], %45 {strides = array<i32>} : memref<2x24x256xf32, #tpu.memory_space<vmem>>, vector<2x2x256xf32>,
    %c239_i32 = arith.constant 239 : i32
    %47 = tpu.dynamic_rotate %3 by %c239_i32 dim 2 : vector<2x2x256xf32>, i32 -> vector<2x2x256xf32>
    %48 = vector.extract_strided_slice %0 {offsets = [8, 0], sizes = [1, 256], strides = [1, 1]} : vector<9x256xf32> to vector<1x256xf32>
    %49 = vector.shape_cast %48 : vector<1x256xf32> to vector<1x1x256xf32>
    %50 = vector.broadcast %49 : vector<1x1x256xf32> to vector<2x2x256xf32>
    %51 = arith.mulf %47, %50 : vector<2x2x256xf32>
    %c0_21 = arith.constant 0 : index
    %c16 = arith.constant 16 : index
    %c0_22 = arith.constant 0 : index
    %52 = vector.load %arg7[%c0_21, %c16, %c0_22] : memref<2x24x256xf32, #tpu.memory_space<vmem>>, vector<2x2x256xf32>
    tpu.vector_store %arg7[%c0_21, %c16, %c0_22], %51 {strides = array<i32>} : memref<2x24x256xf32, #tpu.memory_space<vmem>>, vector<2x2x256xf32>,
    %cst = arith.constant 1.000000e+00 : f32
    %53 = vector.broadcast %cst : f32 to vector<2x6x256xf32>
    %c0_23 = arith.constant 0 : index
    %c18 = arith.constant 18 : index
    %c0_24 = arith.constant 0 : index
    %54 = vector.load %arg7[%c0_23, %c18, %c0_24] : memref<2x24x256xf32, #tpu.memory_space<vmem>>, vector<2x6x256xf32>
    tpu.vector_store %arg7[%c0_23, %c18, %c0_24], %53 {strides = array<i32>} : memref<2x24x256xf32, #tpu.memory_space<vmem>>, vector<2x6x256xf32>,
    %c0_25 = arith.constant 0 : index
    %c0_26 = arith.constant 0 : index
    %55 = vector.load %arg3[%c0_25, %c0_26] : memref<8x24xf32, #tpu.memory_space<vmem>>, vector<8x24xf32>
    %c0_27 = arith.constant 0 : index
    %c0_28 = arith.constant 0 : index
    %c0_29 = arith.constant 0 : index
    %56 = vector.load %arg7[%c0_27, %c0_28, %c0_29] : memref<2x24x256xf32, #tpu.memory_space<vmem>>, vector<1x24x256xf32>
    %57 = vector.shape_cast %56 : vector<1x24x256xf32> to vector<24x256xf32>
    %cst_30 = arith.constant dense<0.000000e+00> : vector<8x256xf32>
    %58 = tpu.matmul %55, %57, %cst_30 {dimension_numbers = #tpu.dot_dimension_numbers<[1], [0], [0], [1], [0, 0, 1, 1], [], []>} : vector<8x24xf32>, vector<24x256xf32>, vector<8x256xf32> -> vector<8x256xf32>
    %59 = vector.extract_strided_slice %58 {offsets = [0, 0], sizes = [2, 256], strides = [1, 1]} : vector<8x256xf32> to vector<2x256xf32>
    %c1 = arith.constant 1 : index
    %c0_31 = arith.constant 0 : index
    %c0_32 = arith.constant 0 : index
    %60 = vector.load %arg7[%c1, %c0_31, %c0_32] : memref<2x24x256xf32, #tpu.memory_space<vmem>>, vector<1x24x256xf32>
    %61 = vector.shape_cast %60 : vector<1x24x256xf32> to vector<24x256xf32>
    %cst_33 = arith.constant dense<0.000000e+00> : vector<8x256xf32>
    %62 = tpu.matmul %55, %61, %cst_33 {dimension_numbers = #tpu.dot_dimension_numbers<[1], [0], [0], [1], [0, 0, 1, 1], [], []>} : vector<8x24xf32>, vector<24x256xf32>, vector<8x256xf32> -> vector<8x256xf32>
    %63 = vector.extract_strided_slice %62 {offsets = [0, 0], sizes = [2, 256], strides = [1, 1]} : vector<8x256xf32> to vector<2x256xf32>
    %64 = vector.shape_cast %59 : vector<2x256xf32> to vector<1x2x256xf32>
    %65 = vector.shape_cast %63 : vector<2x256xf32> to vector<1x2x256xf32>
    %66 = tpu.concatenate %64, %65 in 0 : vector<1x2x256xf32>, vector<1x2x256xf32> -> vector<2x2x256xf32>
    %67 = arith.addf %2, %66 : vector<2x2x256xf32>
    %c0_34 = arith.constant 0 : index
    %c0_35 = arith.constant 0 : index
    %c0_36 = arith.constant 0 : index
    %68 = vector.load %arg5[%c0_34, %c0_35, %c0_36] : memref<2x4x256xf32, #tpu.memory_space<vmem>>, vector<2x2x256xf32>
    tpu.vector_store %arg5[%c0_34, %c0_35, %c0_36], %67 {strides = array<i32>} : memref<2x4x256xf32, #tpu.memory_space<vmem>>, vector<2x2x256xf32>,
    %c17_i32_37 = arith.constant 17 : i32
    %69 = tpu.dynamic_rotate %67 by %c17_i32_37 dim 2 : vector<2x2x256xf32>, i32 -> vector<2x2x256xf32>
    %70 = vector.extract_strided_slice %0 {offsets = [0, 0], sizes = [1, 256], strides = [1, 1]} : vector<9x256xf32> to vector<1x256xf32>
    %71 = vector.shape_cast %70 : vector<1x256xf32> to vector<1x1x256xf32>
    %72 = vector.broadcast %71 : vector<1x1x256xf32> to vector<2x2x256xf32>
    %73 = arith.mulf %69, %72 : vector<2x2x256xf32>
    %c0_38 = arith.constant 0 : index
    %c0_39 = arith.constant 0 : index
    %c0_40 = arith.constant 0 : index
    %74 = vector.load %arg7[%c0_38, %c0_39, %c0_40] : memref<2x24x256xf32, #tpu.memory_space<vmem>>, vector<2x2x256xf32>
    tpu.vector_store %arg7[%c0_38, %c0_39, %c0_40], %73 {strides = array<i32>} : memref<2x24x256xf32, #tpu.memory_space<vmem>>, vector<2x2x256xf32>,
    %c16_i32_41 = arith.constant 16 : i32
    %75 = tpu.dynamic_rotate %67 by %c16_i32_41 dim 2 : vector<2x2x256xf32>, i32 -> vector<2x2x256xf32>
    %76 = vector.extract_strided_slice %0 {offsets = [1, 0], sizes = [1, 256], strides = [1, 1]} : vector<9x256xf32> to vector<1x256xf32>
    %77 = vector.shape_cast %76 : vector<1x256xf32> to vector<1x1x256xf32>
    %78 = vector.broadcast %77 : vector<1x1x256xf32> to vector<2x2x256xf32>
    %79 = arith.mulf %75, %78 : vector<2x2x256xf32>
    %c0_42 = arith.constant 0 : index
    %c2_43 = arith.constant 2 : index
    %c0_44 = arith.constant 0 : index
    %80 = vector.load %arg7[%c0_42, %c2_43, %c0_44] : memref<2x24x256xf32, #tpu.memory_space<vmem>>, vector<2x2x256xf32>
    tpu.vector_store %arg7[%c0_42, %c2_43, %c0_44], %79 {strides = array<i32>} : memref<2x24x256xf32, #tpu.memory_space<vmem>>, vector<2x2x256xf32>,
    %c15_i32_45 = arith.constant 15 : i32
    %81 = tpu.dynamic_rotate %67 by %c15_i32_45 dim 2 : vector<2x2x256xf32>, i32 -> vector<2x2x256xf32>
    %82 = vector.extract_strided_slice %0 {offsets = [2, 0], sizes = [1, 256], strides = [1, 1]} : vector<9x256xf32> to vector<1x256xf32>
    %83 = vector.shape_cast %82 : vector<1x256xf32> to vector<1x1x256xf32>
    %84 = vector.broadcast %83 : vector<1x1x256xf32> to vector<2x2x256xf32>
    %85 = arith.mulf %81, %84 : vector<2x2x256xf32>
    %c0_46 = arith.constant 0 : index
    %c4_47 = arith.constant 4 : index
    %c0_48 = arith.constant 0 : index
    %86 = vector.load %arg7[%c0_46, %c4_47, %c0_48] : memref<2x24x256xf32, #tpu.memory_space<vmem>>, vector<2x2x256xf32>
    tpu.vector_store %arg7[%c0_46, %c4_47, %c0_48], %85 {strides = array<i32>} : memref<2x24x256xf32, #tpu.memory_space<vmem>>, vector<2x2x256xf32>,
    %c1_i32_49 = arith.constant 1 : i32
    %87 = tpu.dynamic_rotate %67 by %c1_i32_49 dim 2 : vector<2x2x256xf32>, i32 -> vector<2x2x256xf32>
    %88 = vector.extract_strided_slice %0 {offsets = [3, 0], sizes = [1, 256], strides = [1, 1]} : vector<9x256xf32> to vector<1x256xf32>
    %89 = vector.shape_cast %88 : vector<1x256xf32> to vector<1x1x256xf32>
    %90 = vector.broadcast %89 : vector<1x1x256xf32> to vector<2x2x256xf32>
    %91 = arith.mulf %87, %90 : vector<2x2x256xf32>
    %c0_50 = arith.constant 0 : index
    %c6_51 = arith.constant 6 : index
    %c0_52 = arith.constant 0 : index
    %92 = vector.load %arg7[%c0_50, %c6_51, %c0_52] : memref<2x24x256xf32, #tpu.memory_space<vmem>>, vector<2x2x256xf32>
    tpu.vector_store %arg7[%c0_50, %c6_51, %c0_52], %91 {strides = array<i32>} : memref<2x24x256xf32, #tpu.memory_space<vmem>>, vector<2x2x256xf32>,
    %c0_53 = arith.constant 0 : index
    %c8_54 = arith.constant 8 : index
    %c0_55 = arith.constant 0 : index
    %93 = vector.load %arg7[%c0_53, %c8_54, %c0_55] : memref<2x24x256xf32, #tpu.memory_space<vmem>>, vector<2x2x256xf32>
    tpu.vector_store %arg7[%c0_53, %c8_54, %c0_55], %67 {strides = array<i32>} : memref<2x24x256xf32, #tpu.memory_space<vmem>>, vector<2x2x256xf32>,
    %c255_i32_56 = arith.constant 255 : i32
    %94 = tpu.dynamic_rotate %67 by %c255_i32_56 dim 2 : vector<2x2x256xf32>, i32 -> vector<2x2x256xf32>
    %95 = vector.extract_strided_slice %0 {offsets = [5, 0], sizes = [1, 256], strides = [1, 1]} : vector<9x256xf32> to vector<1x256xf32>
    %96 = vector.shape_cast %95 : vector<1x256xf32> to vector<1x1x256xf32>
    %97 = vector.broadcast %96 : vector<1x1x256xf32> to vector<2x2x256xf32>
    %98 = arith.mulf %94, %97 : vector<2x2x256xf32>
    %c0_57 = arith.constant 0 : index
    %c10_58 = arith.constant 10 : index
    %c0_59 = arith.constant 0 : index
    %99 = vector.load %arg7[%c0_57, %c10_58, %c0_59] : memref<2x24x256xf32, #tpu.memory_space<vmem>>, vector<2x2x256xf32>
    tpu.vector_store %arg7[%c0_57, %c10_58, %c0_59], %98 {strides = array<i32>} : memref<2x24x256xf32, #tpu.memory_space<vmem>>, vector<2x2x256xf32>,
    %c241_i32_60 = arith.constant 241 : i32
    %100 = tpu.dynamic_rotate %67 by %c241_i32_60 dim 2 : vector<2x2x256xf32>, i32 -> vector<2x2x256xf32>
    %101 = vector.extract_strided_slice %0 {offsets = [6, 0], sizes = [1, 256], strides = [1, 1]} : vector<9x256xf32> to vector<1x256xf32>
    %102 = vector.shape_cast %101 : vector<1x256xf32> to vector<1x1x256xf32>
    %103 = vector.broadcast %102 : vector<1x1x256xf32> to vector<2x2x256xf32>
    %104 = arith.mulf %100, %103 : vector<2x2x256xf32>
    %c0_61 = arith.constant 0 : index
    %c12_62 = arith.constant 12 : index
    %c0_63 = arith.constant 0 : index
    %105 = vector.load %arg7[%c0_61, %c12_62, %c0_63] : memref<2x24x256xf32, #tpu.memory_space<vmem>>, vector<2x2x256xf32>
    tpu.vector_store %arg7[%c0_61, %c12_62, %c0_63], %104 {strides = array<i32>} : memref<2x24x256xf32, #tpu.memory_space<vmem>>, vector<2x2x256xf32>,
    %c240_i32_64 = arith.constant 240 : i32
    %106 = tpu.dynamic_rotate %67 by %c240_i32_64 dim 2 : vector<2x2x256xf32>, i32 -> vector<2x2x256xf32>
    %107 = vector.extract_strided_slice %0 {offsets = [7, 0], sizes = [1, 256], strides = [1, 1]} : vector<9x256xf32> to vector<1x256xf32>
    %108 = vector.shape_cast %107 : vector<1x256xf32> to vector<1x1x256xf32>
    %109 = vector.broadcast %108 : vector<1x1x256xf32> to vector<2x2x256xf32>
    %110 = arith.mulf %106, %109 : vector<2x2x256xf32>
    %c0_65 = arith.constant 0 : index
    %c14_66 = arith.constant 14 : index
    %c0_67 = arith.constant 0 : index
    %111 = vector.load %arg7[%c0_65, %c14_66, %c0_67] : memref<2x24x256xf32, #tpu.memory_space<vmem>>, vector<2x2x256xf32>
    tpu.vector_store %arg7[%c0_65, %c14_66, %c0_67], %110 {strides = array<i32>} : memref<2x24x256xf32, #tpu.memory_space<vmem>>, vector<2x2x256xf32>,
    %c239_i32_68 = arith.constant 239 : i32
    %112 = tpu.dynamic_rotate %67 by %c239_i32_68 dim 2 : vector<2x2x256xf32>, i32 -> vector<2x2x256xf32>
    %113 = vector.extract_strided_slice %0 {offsets = [8, 0], sizes = [1, 256], strides = [1, 1]} : vector<9x256xf32> to vector<1x256xf32>
    %114 = vector.shape_cast %113 : vector<1x256xf32> to vector<1x1x256xf32>
    %115 = vector.broadcast %114 : vector<1x1x256xf32> to vector<2x2x256xf32>
    %116 = arith.mulf %112, %115 : vector<2x2x256xf32>
    %c0_69 = arith.constant 0 : index
    %c16_70 = arith.constant 16 : index
    %c0_71 = arith.constant 0 : index
    %117 = vector.load %arg7[%c0_69, %c16_70, %c0_71] : memref<2x24x256xf32, #tpu.memory_space<vmem>>, vector<2x2x256xf32>
    tpu.vector_store %arg7[%c0_69, %c16_70, %c0_71], %116 {strides = array<i32>} : memref<2x24x256xf32, #tpu.memory_space<vmem>>, vector<2x2x256xf32>,
    %cst_72 = arith.constant 1.000000e+00 : f32
    %118 = vector.broadcast %cst_72 : f32 to vector<2x6x256xf32>
    %c0_73 = arith.constant 0 : index
    %c18_74 = arith.constant 18 : index
    %c0_75 = arith.constant 0 : index
    %119 = vector.load %arg7[%c0_73, %c18_74, %c0_75] : memref<2x24x256xf32, #tpu.memory_space<vmem>>, vector<2x6x256xf32>
    tpu.vector_store %arg7[%c0_73, %c18_74, %c0_75], %118 {strides = array<i32>} : memref<2x24x256xf32, #tpu.memory_space<vmem>>, vector<2x6x256xf32>,
    %c0_76 = arith.constant 0 : index
    %c0_77 = arith.constant 0 : index
    %120 = vector.load %arg4[%c0_76, %c0_77] : memref<8x24xf32, #tpu.memory_space<vmem>>, vector<8x24xf32>
    %c0_78 = arith.constant 0 : index
    %c0_79 = arith.constant 0 : index
    %c0_80 = arith.constant 0 : index
    %121 = vector.load %arg7[%c0_78, %c0_79, %c0_80] : memref<2x24x256xf32, #tpu.memory_space<vmem>>, vector<1x24x256xf32>
    %122 = vector.shape_cast %121 : vector<1x24x256xf32> to vector<24x256xf32>
    %cst_81 = arith.constant dense<0.000000e+00> : vector<8x256xf32>
    %123 = tpu.matmul %120, %122, %cst_81 {dimension_numbers = #tpu.dot_dimension_numbers<[1], [0], [0], [1], [0, 0, 1, 1], [], []>} : vector<8x24xf32>, vector<24x256xf32>, vector<8x256xf32> -> vector<8x256xf32>
    %124 = vector.extract_strided_slice %123 {offsets = [0, 0], sizes = [2, 256], strides = [1, 1]} : vector<8x256xf32> to vector<2x256xf32>
    %cst_82 = arith.constant 5.000000e-01 : f32
    %125 = vector.broadcast %cst_82 : f32 to vector<2x256xf32>
    %126 = arith.mulf %125, %124 : vector<2x256xf32>
    %127 = math.tanh %126 : vector<2x256xf32>
    %cst_83 = arith.constant 1.000000e+00 : f32
    %128 = vector.broadcast %cst_83 : f32 to vector<2x256xf32>
    %129 = arith.mulf %128, %127 : vector<2x256xf32>
    %130 = vector.extract_strided_slice %3 {offsets = [0, 0, 0], sizes = [1, 2, 256], strides = [1, 1, 1]} : vector<2x2x256xf32> to vector<1x2x256xf32>
    %131 = vector.shape_cast %130 : vector<1x2x256xf32> to vector<2x256xf32>
    %132 = math.exp %129 : vector<2x256xf32>
    %133 = arith.mulf %131, %132 : vector<2x256xf32>
    %134 = vector.extract_strided_slice %123 {offsets = [2, 0], sizes = [2, 256], strides = [1, 1]} : vector<8x256xf32> to vector<2x256xf32>
    %135 = arith.addf %133, %134 : vector<2x256xf32>
    %c0_84 = arith.constant 0 : index
    %c2_85 = arith.constant 2 : index
    %c0_86 = arith.constant 0 : index
    %136 = vector.load %arg5[%c0_84, %c2_85, %c0_86] : memref<2x4x256xf32, #tpu.memory_space<vmem>>, vector<1x2x256xf32>
    %137 = vector.shape_cast %136 : vector<1x2x256xf32> to vector<2x256xf32>
    %138 = vector.shape_cast %135 : vector<2x256xf32> to vector<1x2x256xf32>
    tpu.vector_store %arg5[%c0_84, %c2_85, %c0_86], %138 {strides = array<i32>} : memref<2x4x256xf32, #tpu.memory_space<vmem>>, vector<1x2x256xf32>,
    %c0_87 = arith.constant 0 : index
    %c0_88 = arith.constant 0 : index
    %c0_89 = arith.constant 0 : index
    %139 = vector.load %arg6[%c0_87, %c0_88, %c0_89] : memref<2x2x256xf32, #tpu.memory_space<vmem>>, vector<1x2x256xf32>
    %140 = vector.shape_cast %139 : vector<1x2x256xf32> to vector<2x256xf32>
    %141 = vector.shape_cast %129 : vector<2x256xf32> to vector<1x2x256xf32>
    tpu.vector_store %arg6[%c0_87, %c0_88, %c0_89], %141 {strides = array<i32>} : memref<2x2x256xf32, #tpu.memory_space<vmem>>, vector<1x2x256xf32>,
    %c1_90 = arith.constant 1 : index
    %c0_91 = arith.constant 0 : index
    %c0_92 = arith.constant 0 : index
    %142 = vector.load %arg7[%c1_90, %c0_91, %c0_92] : memref<2x24x256xf32, #tpu.memory_space<vmem>>, vector<1x24x256xf32>
    %143 = vector.shape_cast %142 : vector<1x24x256xf32> to vector<24x256xf32>
    %cst_93 = arith.constant dense<0.000000e+00> : vector<8x256xf32>
    %144 = tpu.matmul %120, %143, %cst_93 {dimension_numbers = #tpu.dot_dimension_numbers<[1], [0], [0], [1], [0, 0, 1, 1], [], []>} : vector<8x24xf32>, vector<24x256xf32>, vector<8x256xf32> -> vector<8x256xf32>
    %145 = vector.extract_strided_slice %144 {offsets = [0, 0], sizes = [2, 256], strides = [1, 1]} : vector<8x256xf32> to vector<2x256xf32>
    %cst_94 = arith.constant 5.000000e-01 : f32
    %146 = vector.broadcast %cst_94 : f32 to vector<2x256xf32>
    %147 = arith.mulf %146, %145 : vector<2x256xf32>
    %148 = math.tanh %147 : vector<2x256xf32>
    %cst_95 = arith.constant 1.000000e+00 : f32
    %149 = vector.broadcast %cst_95 : f32 to vector<2x256xf32>
    %150 = arith.mulf %149, %148 : vector<2x256xf32>
    %151 = vector.extract_strided_slice %3 {offsets = [1, 0, 0], sizes = [1, 2, 256], strides = [1, 1, 1]} : vector<2x2x256xf32> to vector<1x2x256xf32>
    %152 = vector.shape_cast %151 : vector<1x2x256xf32> to vector<2x256xf32>
    %153 = math.exp %150 : vector<2x256xf32>
    %154 = arith.mulf %152, %153 : vector<2x256xf32>
    %155 = vector.extract_strided_slice %144 {offsets = [2, 0], sizes = [2, 256], strides = [1, 1]} : vector<8x256xf32> to vector<2x256xf32>
    %156 = arith.addf %154, %155 : vector<2x256xf32>
    %c1_96 = arith.constant 1 : index
    %c2_97 = arith.constant 2 : index
    %c0_98 = arith.constant 0 : index
    %157 = vector.load %arg5[%c1_96, %c2_97, %c0_98] : memref<2x4x256xf32, #tpu.memory_space<vmem>>, vector<1x2x256xf32>
    %158 = vector.shape_cast %157 : vector<1x2x256xf32> to vector<2x256xf32>
    %159 = vector.shape_cast %156 : vector<2x256xf32> to vector<1x2x256xf32>
    tpu.vector_store %arg5[%c1_96, %c2_97, %c0_98], %159 {strides = array<i32>} : memref<2x4x256xf32, #tpu.memory_space<vmem>>, vector<1x2x256xf32>,
    %c1_99 = arith.constant 1 : index
    %c0_100 = arith.constant 0 : index
    %c0_101 = arith.constant 0 : index
    %160 = vector.load %arg6[%c1_99, %c0_100, %c0_101] : memref<2x2x256xf32, #tpu.memory_space<vmem>>, vector<1x2x256xf32>
    %161 = vector.shape_cast %160 : vector<1x2x256xf32> to vector<2x256xf32>
    %162 = vector.shape_cast %150 : vector<2x256xf32> to vector<1x2x256xf32>
    tpu.vector_store %arg6[%c1_99, %c0_100, %c0_101], %162 {strides = array<i32>} : memref<2x2x256xf32, #tpu.memory_space<vmem>>, vector<1x2x256xf32>,
    return
  }
  func.func @transform_0(%arg0: i32) -> (i32, i32) {
    %c0_i32 = arith.constant 0 : i32
    %c0_i32_0 = arith.constant 0 : i32
    %c0_i32_1 = arith.constant 0 : i32
    return %c0_i32, %c0_i32_0 : i32, i32
  }
  func.func @transform_1(%arg0: i32) -> (i32, i32, i32) {
    %c0_i32 = arith.constant 0 : i32
    %c0_i32_0 = arith.constant 0 : i32
    %c0_i32_1 = arith.constant 0 : i32
    return %arg0, %c0_i32, %c0_i32_0 : i32, i32, i32
  }
  func.func @transform_2(%arg0: i32) -> (i32, i32) {
    %c0_i32 = arith.constant 0 : i32
    %c0_i32_0 = arith.constant 0 : i32
    %c0_i32_1 = arith.constant 0 : i32
    return %c0_i32, %c0_i32_0 : i32, i32
  }
  func.func @transform_3(%arg0: i32) -> (i32, i32) {
    %c0_i32 = arith.constant 0 : i32
    %c0_i32_0 = arith.constant 0 : i32
    %c0_i32_1 = arith.constant 0 : i32
    return %c0_i32, %c0_i32_0 : i32, i32
  }
  func.func @transform_4(%arg0: i32) -> (i32, i32, i32) {
    %c0_i32 = arith.constant 0 : i32
    %c0_i32_0 = arith.constant 0 : i32
    %c0_i32_1 = arith.constant 0 : i32
    return %arg0, %c0_i32, %c0_i32_0 : i32, i32, i32
  }
  func.func @transform_5(%arg0: i32) -> (i32, i32, i32) {
    %c0_i32 = arith.constant 0 : i32
    %c0_i32_0 = arith.constant 0 : i32
    %c0_i32_1 = arith.constant 0 : i32
    return %arg0, %c0_i32, %c0_i32_0 : i32, i32, i32
  }
}

</mosaic_0001>

<bundles_post_ra>
// kernel: tpu_custom_call.1
= control target key start
LH: loop header
LB: loop body
LE: loop exit
PB: predicated region body
PF: predicated region fallthrough
CT: control target
= control target key end

     0   :  { %11 = vsyncpa [#allocation4], 0  ;;  %s1842_s0 = inlined_call_operand.hbm [shape: f32[9,256], index: 0, kind: input, shape index: {}]   ;;  %s1843_s1 = inlined_call_operand.hbm [shape: f32[2,4,256], index: 1, kind: input, shape index: {}]   ;;  %s1844_s2 = inlined_call_operand.hbm [shape: f32[8,24], index: 2, kind: input, shape index: {}]   ;;  %s1845_s3 = inlined_call_operand.hbm [shape: f32[8,24], index: 3, kind: input, shape index: {}]   ;;  %s1846_s4 = inlined_call_operand.hbm [shape: f32[2,4,256], index: 4, kind: output, shape index: {0}]   ;;  %s1847_s5 = inlined_call_operand.hbm [shape: f32[2,2,256], index: 5, kind: output, shape index: {1}]  }
   0x1   :  { %12 = vsyncpa [#allocation7], 0 }
   0x2   :  { %13 = vsyncpa [#allocation10], 0 }
   0x3   :  { %14 = vsyncpa [#allocation5], 0  ;;  %s33_s20 = sshll.u32 %s1843_s1, 4  ;;  %s34_s20 = int_to_ptr.hbm [resolvable:$true] %s33_s20 }
   0x4   :  { %15 = vsyncpa [#allocation13], 0  ;;  %s1337_s21 = smov [#allocation6]   ;;  %s20_s25 = sshll.u32 %s1842_s0, 4  ;;  %s21_s25 = int_to_ptr.hbm [resolvable:$true] %s20_s25 }
   0x5   :  { %s35_s22 = sshll.u32 %s1337_s21, 4  ;;  %s1338_s26 = smov 128   ;;  %s36_s22 = int_to_ptr.vmem [resolvable:$true] %s35_s22 }
   0x6   :  { %s1339_s27 = smov 8   ;;  %s1340_s28 = smov [#allocation3]  }
   0x7   :  { %41 = dma.hbm_to_vmem [thread:$0]  %s34_s20, 256, %s36_s22, [#allocation7], %s1338_s26, %s1338_s26, %s1339_s27  }
   0x8   :  { %s22_s29 = sshll.u32 %s1340_s28, 4  ;;  %s1341_s1 = smov 256   ;;  %s23_s29 = int_to_ptr.vmem [resolvable:$true] %s22_s29 }
   0x9   :  { %s1342_s30 = smov 16   ;;  %s47_s8 = sshll.u32 %s1844_s2, 4  ;;  %s48_s8 = int_to_ptr.hbm [resolvable:$true] %s47_s8 }
   0xa   :  { %28 = dma.hbm_to_vmem [thread:$0]  %s21_s25, 512, %s23_s29, [#allocation4], %s1341_s1, %s1341_s1, %s1342_s30  }
   0xb   :  { %s1343_s0 = smov [#allocation8]   ;;  %s58_s12 = sshll.u32 %s1845_s3, 4  ;;  %s59_s12 = int_to_ptr.hbm [resolvable:$true] %s58_s12 }
   0xc   :  { %s49_s9 = sshll.u32 %s1343_s0, 4  ;;  %s1344_s13 = smov [#allocation9]   ;;  %s50_s9 = int_to_ptr.vmem [resolvable:$true] %s49_s9 }
   0xd   :  { %52 = dma.hbm_to_vmem [thread:$0]  %s48_s8, 128, %s50_s9, [#allocation7]  }
   0xe   :  { %s60_s14 = sshll.u32 %s1344_s13, 4  ;;  %s61_s14 = int_to_ptr.vmem [resolvable:$true] %s60_s14 }
   0xf   :  { %63 = dma.hbm_to_vmem [thread:$0]  %s59_s12, 128, %s61_s14, [#allocation10]  }
  0x10   :  { %1327 = dma.done.wait [#allocation4], 512  }
  0x11   :  { %1328 = vsyncadd [#allocation4], 4294966784 }
  0x12   :  { %1329 = dma.done.wait [#allocation7], 384  }
  0x13   :  { %1330 = vsyncadd [#allocation7], 4294966912 }
  0x14   :  { %1331 = dma.done.wait [#allocation10], 128  }
  0x15   :  { %1332 = vsyncadd [#allocation10], 4294967168  ;;  %v1403_v0 = vld [vmem:[#allocation6 + $0x8] sm:$0xff]  ;;  %v1405_v1 = vld [vmem:[#allocation6] sm:$0xff]  ;;  %s1345_s2 = smov 17   ;;  %s1346_s3 = smov 15  }
  0x16   :  { %92 = vst [vmem:[#allocation1 + $0x10] ss:$2 sm:$0xff] %v1403_v0  ;;  %s1347_s15 = smov 1   ;;  %s1348_s16 = smov 127   ;;  %vm496_vm8 = vcmask 195584   ;;  %vm593_vm9 = vcmask 1043456  }
  0x17   :  { %88 = vst [vmem:[#allocation1] ss:$2 sm:$0xff] %v1405_v1  ;;  %s1349_s17 = smov 113   ;;  %s1350_s18 = smov 112   ;;  %vm1018_vm10 = vcmask 1041408  }
  0x18   :  { %s1351_s19 = smov 111   ;;  %s1353_s20 = smov [#allocation12]  }
  0x19   :  { %s1115_s21 = sshll.u32 %s1353_s20, 4  ;;  %s1117_s24 = sshll.u32 %s1847_s5, 4  ;;  %s1116_s21 = int_to_ptr.vmem [resolvable:$true] %s1115_s21  ;;  %s1118_s24 = int_to_ptr.hbm [resolvable:$true] %s1117_s24 }
  0x1a   :  { %s1354_s25 = smov 64   ;;  %s1355_s28 = smov 4  }
  0x1b   :  { %s1356_s5 = smov [#allocation11]   ;;  %s1104_s6 = sshll.u32 %s1846_s4, 4  ;;  %s1105_s6 = int_to_ptr.hbm [resolvable:$true] %s1104_s6 }
  0x1c   :  { %s1102_s29 = sshll.u32 %s1356_s5, 4  ;;  %s1103_s29 = int_to_ptr.vmem [resolvable:$true] %s1102_s29 }
  0x1d   :  { %v94_v2 = vld.sshfl [vmem:[#allocation1 + $0x18] sm:$0xff pattern:$0x75316420]  ;;  %v93_v3 = vld.sshfl [vmem:[#allocation1 + $0x10] sm:$0xff pattern:$0x75316420] }
  0x1e   :  { %v98_v4 = vrot.slane %v94_v2, 2  ;;  %132 = vst [vmem:[#allocation1 + $0x10] ss:$2 sm:$0xff] %v1403_v0  ;;  %v1410_v5 = vld.sshfl [vmem:[#allocation1] sm:$0xff pattern:$0x75316420] }
  0x1f   :  { %v1412_v6 = vld.sshfl [vmem:[#allocation1 + $0x8] sm:$0xff pattern:$0x75316420]  ;;  %v97_v7 = vrot.slane %v93_v3, 2 }
  0x20   :  { %109 = vrot.lane.b32.xlu0 %v98_v4, %s1345_s2  ;;  %128 = vst [vmem:[#allocation1] ss:$2 sm:$0xff] %v1405_v1 }
  0x21   :  { %105 = vrot.lane.b32.xlu2 %v97_v7, %s1345_s2  ;;  %v95_v7 = vrot.slane %v1410_v5, 2 }
  0x25   :  { %v134_v8 = vld.sshfl [vmem:[#allocation1 + $0x18] sm:$0xff pattern:$0x75316420]  ;;  %v133_v9 = vld.sshfl [vmem:[#allocation1 + $0x10] sm:$0xff pattern:$0x75316420] }
  0x26   :  { %v138_v10 = vrot.slane %v134_v8, 2  ;;  %182 = vst [vmem:[#allocation1 + $0x10] ss:$2 sm:$0xff] %v1403_v0  ;;  %v137_v11 = vrot.slane %v133_v9, 2  ;;  %v96_v9 = vrot.slane %v1412_v6, 2 }
  0x27   :  { %v130_v12 = vld.sshfl [vmem:[#allocation1 + $0x8] sm:$0xff pattern:$0x75316420]  ;;  %v129_v13 = vld.sshfl [vmem:[#allocation1] sm:$0xff pattern:$0x75316420] }
  0x28   :  { %149 = vrot.lane.b32.xlu0 %v138_v10, %s1342_s30  ;;  %v136_v14 = vrot.slane %v130_v12, 2  ;;  %178 = vst [vmem:[#allocation1] ss:$2 sm:$0xff] %v1405_v1  ;;  %v135_v15 = vrot.slane %v129_v13, 2 }
  0x29   :  { %145 = vrot.lane.b32.xlu2 %v137_v11, %s1342_s30  ;;  %v111_v11 = vlaneseq }
  0x2a   :  { %147 = vrot.lane.b32.xlu1 %v136_v14, %s1342_s30  ;;  %v1482_v14 = vld [vmem:[#allocation3] sm:$0xff] }
  0x2b   :  { %v1480_v13 = vand.u32 127, %v111_v11  ;;  %v1488_v5 = vperm.slane %v1482_v14, 0 }
  0x2d   :  { %v183_v16 = vld.sshfl [vmem:[#allocation1 + $0x10] sm:$0xff pattern:$0x75316420]  ;;  %v184_v17 = vld.sshfl [vmem:[#allocation1 + $0x18] sm:$0xff pattern:$0x75316420] }
  0x2e   :  { %v187_v18 = vrot.slane %v183_v16, 2  ;;  %232 = vst [vmem:[#allocation1 + $0x10] ss:$2 sm:$0xff] %v1403_v0  ;;  %v188_v19 = vrot.slane %v184_v17, 2  ;;  %vm113_vm0 = vcmp.lt.s32.totalorder %v1480_v13, 17  ;;  %vm151_vm1 = vcmp.lt.s32.totalorder %v1480_v13, 16 }
  0x2f   :  { %v179_v20 = vld.sshfl [vmem:[#allocation1] sm:$0xff pattern:$0x75316420]  ;;  %v1423_v21 = vld.sshfl [vmem:[#allocation1 + $0x8] sm:$0xff pattern:$0x75316420] }
  0x30   :  { %143 = vrot.lane.b32.xlu0 %v135_v15, %s1342_s30  ;;  %228 = vst [vmem:[#allocation1] ss:$2 sm:$0xff] %v1405_v1  ;;  %v185_v22 = vrot.slane %v179_v20, 2  ;;  %v186_v62 = vrot.slane %v1423_v21, 2  ;;  %v1484_v15 = vld [vmem:[#allocation3 + $0x8] sm:$0xff]  ;;  %vm201_vm2 = vcmp.lt.s32.totalorder %v1480_v13, 15 }
  0x31   :  { %199 = vrot.lane.b32.xlu2 %v188_v19, %s1346_s3  ;;  %v1491_v16 = vperm.slane %v1484_v15, 0  ;;  %vm251_vm3 = vcmp.lt.s32.totalorder %v1480_v13, 1  ;;  %vm420_vm4 = vcmp.lt.s32.totalorder %v1480_v13, 112  ;;  %vm320_vm5 = vcmp.lt.s32.totalorder %v1480_v13, 127 }
  0x32   :  { %195 = vrot.lane.b32.xlu1 %v187_v18, %s1346_s3  ;;  %vm370_vm6 = vcmp.lt.s32.totalorder %v1480_v13, 113  ;;  %vm470_vm7 = vcmp.lt.s32.totalorder %v1480_v13, 111 }
  0x35   :  { %v234_v23 = vld.sshfl [vmem:[#allocation1 + $0x18] sm:$0xff pattern:$0x75316420]  ;;  %v233_v24 = vld.sshfl [vmem:[#allocation1 + $0x10] sm:$0xff pattern:$0x75316420] }
  0x36   :  { %v238_v25 = vrot.slane %v234_v23, 2  ;;  %v237_v26 = vrot.slane %v233_v24, 2  ;;  %282 = vst [vmem:[#allocation1 + $0x10] ss:$2 sm:$0xff] %v1403_v0  ;;  %v1501_v23 = vperm.slane %v1482_v14, 1  ;;  %v1504_v24 = vperm.slane %v1484_v15, 1 }
  0x37   :  { %v1430_v27 = vld.sshfl [vmem:[#allocation1] sm:$0xff pattern:$0x75316420]  ;;  %v1432_v28 = vld.sshfl [vmem:[#allocation1 + $0x8] sm:$0xff pattern:$0x75316420] }
  0x38   :  { %245 = vrot.lane.b32.xlu0 %v237_v26, %s1347_s15  ;;  %278 = vst [vmem:[#allocation1] ss:$2 sm:$0xff] %v1405_v1  ;;  %v235_v59 = vrot.slane %v1430_v27, 2  ;;  %v236_v4 = vrot.slane %v1432_v28, 2 }
  0x39   :  { %193 = vrot.lane.b32.xlu2 %v185_v22, %s1346_s3 }
  0x3a   :  { %249 = vrot.lane.b32.xlu1 %v238_v25, %s1347_s15 }
  0x3d   :  { %v1438_v29 = vld.sshfl [vmem:[#allocation1 + $0x10] sm:$0xff pattern:$0x75316420]  ;;  %v1440_v30 = vld.sshfl [vmem:[#allocation1 + $0x18] sm:$0xff pattern:$0x75316420] }
  0x3e   :  { %301 = vst [vmem:[#allocation1 + $0x10] ss:$2 sm:$0xff] %v1403_v0 }
  0x3f   :  { %v1443_v31 = vld.sshfl [vmem:[#allocation1] sm:$0xff pattern:$0x75316420]  ;;  %v1445_v32 = vld.sshfl [vmem:[#allocation1 + $0x8] sm:$0xff pattern:$0x75316420] }
  0x40   :  { %297 = vst [vmem:[#allocation1] ss:$2 sm:$0xff] %v1405_v1 }
  0x45   :  { %v302_v33 = vld.sshfl [vmem:[#allocation1 + $0x10] sm:$0xff pattern:$0x75316420]  ;;  %v303_v34 = vld.sshfl [vmem:[#allocation1 + $0x18] sm:$0xff pattern:$0x75316420] }
  0x46   :  { %v306_v35 = vrot.slane %v302_v33, 2  ;;  %351 = vst [vmem:[#allocation1 + $0x10] ss:$2 sm:$0xff] %v1403_v0  ;;  %v307_v40 = vrot.slane %v303_v34, 2 }
  0x47   :  { %v298_v36 = vld.sshfl [vmem:[#allocation1] sm:$0xff pattern:$0x75316420]  ;;  %v299_v37 = vld.sshfl [vmem:[#allocation1 + $0x8] sm:$0xff pattern:$0x75316420] }
  0x48   :  { %v304_v38 = vrot.slane %v298_v36, 2  ;;  %314 = vrot.lane.b32.xlu0 %v306_v35, %s1348_s16  ;;  %v305_v39 = vrot.slane %v299_v37, 2  ;;  %347 = vst [vmem:[#allocation1] ss:$2 sm:$0xff] %v1405_v1  ;;  %v1516_v37 = vperm.slane %v1482_v14, 2 }
  0x4a   :  { %312 = vrot.lane.b32.xlu1 %v304_v38, %s1348_s16  ;;  %316 = vrot.lane.b32.xlu2 %v305_v39, %s1348_s16  ;;  %v1519_v38 = vperm.slane %v1484_v15, 2 }
  0x4d   :  { %v352_v41 = vld.sshfl [vmem:[#allocation1 + $0x10] sm:$0xff pattern:$0x75316420]  ;;  %v353_v42 = vld.sshfl [vmem:[#allocation1 + $0x18] sm:$0xff pattern:$0x75316420] }
  0x4e   :  { %v356_v43 = vrot.slane %v352_v41, 2  ;;  %401 = vst [vmem:[#allocation1 + $0x10] ss:$2 sm:$0xff] %v1403_v0  ;;  %v357_v49 = vrot.slane %v353_v42, 2 }
  0x4f   :  { %v348_v44 = vld.sshfl [vmem:[#allocation1] sm:$0xff pattern:$0x75316420]  ;;  %v349_v45 = vld.sshfl [vmem:[#allocation1 + $0x8] sm:$0xff pattern:$0x75316420] }
  0x50   :  { %318 = vrot.lane.b32.xlu0 %v307_v40, %s1348_s16  ;;  %397 = vst [vmem:[#allocation1] ss:$2 sm:$0xff] %v1405_v1  ;;  %v354_v46 = vrot.slane %v348_v44, 2  ;;  %v355_v55 = vrot.slane %v349_v45, 2 }
  0x52   :  { %364 = vrot.lane.b32.xlu1 %v356_v43, %s1349_s17 }
  0x55   :  { %v402_v47 = vld.sshfl [vmem:[#allocation1 + $0x10] sm:$0xff pattern:$0x75316420]  ;;  %v403_v48 = vld.sshfl [vmem:[#allocation1 + $0x18] sm:$0xff pattern:$0x75316420] }
  0x56   :  { %v406_v50 = vrot.slane %v402_v47, 2  ;;  %451 = vst [vmem:[#allocation1 + $0x10] ss:$2 sm:$0xff] %v1403_v0  ;;  %v407_v54 = vrot.slane %v403_v48, 2 }
  0x57   :  { %v399_v51 = vld.sshfl [vmem:[#allocation1 + $0x8] sm:$0xff pattern:$0x75316420]  ;;  %v398_v52 = vld.sshfl [vmem:[#allocation1] sm:$0xff pattern:$0x75316420] }
  0x58   :  { %362 = vrot.lane.b32.xlu0 %v354_v46, %s1349_s17  ;;  %414 = vrot.lane.b32.xlu2 %v406_v50, %s1350_s18  ;;  %447 = vst [vmem:[#allocation1] ss:$2 sm:$0xff] %v1405_v1  ;;  %v405_v53 = vrot.slane %v399_v51, 2  ;;  %v404_v58 = vrot.slane %v398_v52, 2 }
  0x5a   :  { %368 = vrot.lane.b32.xlu1 %v357_v49, %s1349_s17 }
  0x5d   :  { %v452_v56 = vld.sshfl [vmem:[#allocation1 + $0x10] sm:$0xff pattern:$0x75316420]  ;;  %v453_v61 = vld.sshfl [vmem:[#allocation1 + $0x18] sm:$0xff pattern:$0x75316420] }
  0x5e   :  { %v456_v57 = vrot.slane %v452_v56, 2  ;;  %v457_v2 = vrot.slane %v453_v61, 2  ;;  %v1538_v56 = vperm.slane %v1484_v15, 3 }
  0x5f   :  { %v449_v60 = vld.sshfl [vmem:[#allocation1 + $0x8] sm:$0xff pattern:$0x75316420]  ;;  %v448_v3 = vld.sshfl [vmem:[#allocation1] sm:$0xff pattern:$0x75316420] }
  0x60   :  { %416 = vrot.lane.b32.xlu0 %v405_v53, %s1350_s18  ;;  %418 = vrot.lane.b32.xlu2 %v407_v54, %s1350_s18  ;;  %v455_v63 = vrot.slane %v449_v60, 2  ;;  %v454_v8 = vrot.slane %v448_v3, 2  ;;  %v288_v3 = vrot.slane %v1440_v30, 2  ;;  %v1562_v30 = vperm.slane %v1484_v15, 5 }
  0x62   :  { %366 = vrot.lane.b32.xlu1 %v355_v55, %s1349_s17  ;;  %v1535_v55 = vperm.slane %v1482_v14, 3  ;;  %296 = vst [vmem:[#allocation2 + $0x48] sm:$0x3] %v288_v3 }
  0x68   :  { %464 = vrot.lane.b32.xlu0 %v456_v57, %s1351_s19  ;;  %412 = vrot.lane.b32.xlu2 %v404_v58, %s1350_s18 }
  0x6a   :  { %243 = vrot.lane.b32.xlu1 %v235_v59, %s1347_s15 }
  0x70   :  { %197 = vrot.lane.b32.xlu0 %v186_v62, %s1346_s3  ;;  %466 = vrot.lane.b32.xlu2 %v455_v63, %s1351_s19 }
  0x72   :  { %468 = vrot.lane.b32.xlu1 %v457_v2, %s1351_s19  ;;  %v287_v2 = vrot.slane %v1438_v29, 2  ;;  %v1559_v29 = vperm.slane %v1482_v14, 5 }
  0x74   :  { %295 = vst [vmem:[#allocation2 + $0x8] sm:$0x3] %v287_v2 }
  0x78   :  { %247 = vrot.lane.b32.xlu2 %v236_v4, %s1347_s15  ;;  %103 = vrot.lane.b32.xlu0 %v95_v7, %s1345_s2  ;;  %v1550_v7 = vperm.slane %v1482_v14, 7 }
  0x7a   :  { %462 = vrot.lane.b32.xlu1 %v454_v8, %s1351_s19  ;;  %v1553_v8 = vperm.slane %v1484_v15, 7 }
  0x7b   :  { %v106_v10 = vpop.permute.xlu2 %105 }
  0x82   :  { %107 = vrot.lane.b32.xlu1 %v96_v9, %s1345_s2  ;;  %v285_v9 = vrot.slane %v1443_v31, 2 }
  0x83   :  { %v146_v12 = vpop.permute.xlu2 %145 }
  0x84   :  { %293 = vst [vmem:[#allocation2 + $0x50] sm:$0x3] %v285_v9 }
  0x8b   :  { %v200_v21 = vpop.permute.xlu2 %199 }
  0x92   :  { %v110_v6 = vpop.permute.xlu0 %109 }
  0x93   :  { %v115_v17 = vsel %vm113_vm0, %v106_v10, %v110_v6  ;;  %v117_v18 = vsel %vm113_vm0, %v110_v6, %v106_v10  ;;  %v1512_v36 = vpop.permute.xlu2 %193  ;;  %v286_v10 = vrot.slane %v1445_v32, 2 }
  0x94   :  { %v122_v19 = vmul.f32 %v1488_v5, %v117_v18  ;;  %v123_v20 = vmul.f32 %v1491_v16, %v115_v17 }
  0x95   :  { %294 = vst [vmem:[#allocation2 + $0x10] sm:$0x3] %v286_v10 }
  0x96   :  { %126 = vst [vmem:[#allocation2 + $0x58] sm:$0x3] %v122_v19 }
  0x97   :  { %127 = vst [vmem:[#allocation2 + $0x38] sm:$0x3] %v123_v20 }
  0x9a   :  { %v150_v22 = vpop.permute.xlu0 %149 }
  0x9b   :  { %v153_v25 = vsel %vm151_vm1, %v146_v12, %v150_v22  ;;  %v155_v26 = vsel %vm151_vm1, %v150_v22, %v146_v12 }
  0x9c   :  { %v160_v27 = vmul.f32 %v1501_v23, %v155_v26  ;;  %v161_v28 = vmul.f32 %v1504_v24, %v153_v25  ;;  %v148_v33 = vpop.permute.xlu1 %147 }
  0x9e   :  { %v168_v34 = vrot.slane %v160_v27, 6  ;;  %v169_v35 = vrot.slane %v161_v28, 6 }
  0xa0   :  { %176 = vst [vmem:[#allocation2 + $0x58] sm:$0xc] %v168_v34 }
  0xa1   :  { %177 = vst [vmem:[#allocation2 + $0x38] sm:$0xc] %v169_v35 }
  0xa2   :  { %v144_v39 = vpop.permute.xlu0 %143 }
  0xa3   :  { %v152_v40 = vsel %vm151_vm1, %v144_v39, %v148_v33  ;;  %v154_v41 = vsel %vm151_vm1, %v148_v33, %v144_v39 }
  0xa4   :  { %v196_v42 = vpop.permute.xlu1 %195  ;;  %v158_v43 = vmul.f32 %v1501_v23, %v154_v41  ;;  %v159_v44 = vmul.f32 %v1504_v24, %v152_v40  ;;  %v317_v53 = vpop.permute.xlu2 %316 }
  0xa5   :  { %v203_v45 = vsel %vm201_vm2, %v196_v42, %v200_v21  ;;  %v205_v46 = vsel %vm201_vm2, %v200_v21, %v196_v42 }
  0xa6   :  { %v210_v47 = vmul.f32 %v1516_v37, %v205_v46  ;;  %v211_v48 = vmul.f32 %v1519_v38, %v203_v45  ;;  %v166_v49 = vrot.slane %v158_v43, 6  ;;  %v167_v50 = vrot.slane %v159_v44, 6 }
  0xa7   :  { %v1584_v45 = vperm.slane %v1482_v14, 6  ;;  %v1587_v46 = vperm.slane %v1484_v15, 6 }
  0xa8   :  { %v218_v51 = vrot.slane %v210_v47, 4  ;;  %v219_v52 = vrot.slane %v211_v48, 4  ;;  %174 = vst [vmem:[#allocation2 + $0x40] sm:$0xc] %v166_v49  ;;  %v1352_v48 = vmov 1.0  }
  0xa9   :  { %175 = vst [vmem:[#allocation2] sm:$0xc] %v167_v50 }
  0xaa   :  { %226 = vst [vmem:[#allocation2 + $0x58] sm:$0x30] %v218_v51  ;;  %v246_v54 = vpop.permute.xlu0 %245 }
  0xab   :  { %227 = vst [vmem:[#allocation2 + $0x38] sm:$0x30] %v219_v52 }
  0xac   :  { %v250_v57 = vpop.permute.xlu1 %249  ;;  %487 = vst [vmem:[#allocation2 + $0x30] sm:$0xfc] %v1352_v48 }
  0xad   :  { %v253_v58 = vsel %vm251_vm3, %v246_v54, %v250_v57  ;;  %v255_v59 = vsel %vm251_vm3, %v250_v57, %v246_v54  ;;  %485 = vst [vmem:[#allocation2 + $0x18] sm:$0xfc] %v1352_v48 }
  0xae   :  { %v260_v60 = vmul.f32 %v1535_v55, %v255_v59  ;;  %v261_v61 = vmul.f32 %v1538_v56, %v253_v58  ;;  %486 = vst [vmem:[#allocation2 + $0x28] sm:$0xfc] %v1352_v48 }
  0xaf   :  { %488 = vst [vmem:[#allocation2 + $0x20] sm:$0xfc] %v1352_v48 }
  0xb0   :  { %v268_v62 = vrot.slane %v260_v60, 2  ;;  %v269_v63 = vrot.slane %v261_v61, 2 }
  0xb2   :  { %276 = vst [vmem:[#allocation2 + $0x58] sm:$0xc0] %v268_v62  ;;  %v415_v4 = vpop.permute.xlu2 %414 }
  0xb3   :  { %277 = vst [vmem:[#allocation2 + $0x38] sm:$0xc0] %v269_v63 }
  0xba   :  { %v315_v11 = vpop.permute.xlu0 %314  ;;  %v419_v12 = vpop.permute.xlu2 %418 }
  0xbb   :  { %v422_v6 = vsel %vm420_vm4, %v415_v4, %v419_v12  ;;  %v424_v17 = vsel %vm420_vm4, %v419_v12, %v415_v4 }
  0xbc   :  { %v313_v31 = vpop.permute.xlu1 %312  ;;  %v429_v32 = vmul.f32 %v1550_v7, %v422_v6  ;;  %v430_v18 = vmul.f32 %v1553_v8, %v424_v17 }
  0xbd   :  { %v321_v19 = vsel %vm320_vm5, %v313_v31, %v317_v53  ;;  %v323_v20 = vsel %vm320_vm5, %v317_v53, %v313_v31 }
  0xbe   :  { %v327_v21 = vmul.f32 %v1559_v29, %v321_v19  ;;  %v328_v22 = vmul.f32 %v1562_v30, %v323_v20  ;;  %v437_v25 = vrot.slane %v429_v32, 2  ;;  %v438_v26 = vrot.slane %v430_v18, 2 }
  0xc0   :  { %v335_v27 = vrot.slane %v327_v21, 6  ;;  %v336_v28 = vrot.slane %v328_v22, 6  ;;  %445 = vst [vmem:[#allocation2 + $0x8] sm:$0xc0] %v437_v25  ;;  %v1618_v25 = vld [vmem:[#allocation3 + $0x10] ss:$0 sm:$0xff] }
  0xc1   :  { %446 = vst [vmem:[#allocation2 + $0x48] sm:$0xc0] %v438_v26  ;;  %v1620_v26 = vld [vmem:[#allocation3 + $0x18] ss:$0 sm:$0xff] }
  0xc2   :  { %343 = vst [vmem:[#allocation2 + $0x50] sm:$0xc] %v335_v27  ;;  %v319_v33 = vpop.permute.xlu0 %318  ;;  %v413_v44 = vpop.permute.xlu2 %412 }
  0xc3   :  { %344 = vst [vmem:[#allocation2 + $0x10] sm:$0xc] %v336_v28  ;;  %v322_v34 = vsel %vm320_vm5, %v315_v11, %v319_v33  ;;  %v324_v35 = vsel %vm320_vm5, %v319_v33, %v315_v11 }
  0xc4   :  { %v365_v39 = vpop.permute.xlu1 %364  ;;  %v329_v40 = vmul.f32 %v1559_v29, %v322_v34  ;;  %v330_v41 = vmul.f32 %v1562_v30, %v324_v35 }
  0xc6   :  { %v337_v42 = vrot.slane %v329_v40, 6  ;;  %v338_v43 = vrot.slane %v330_v41, 6 }
  0xc8   :  { %345 = vst [vmem:[#allocation2 + $0x8] sm:$0xc] %v337_v42 }
  0xc9   :  { %346 = vst [vmem:[#allocation2 + $0x48] sm:$0xc] %v338_v43 }
  0xca   :  { %v363_v47 = vpop.permute.xlu0 %362  ;;  %v467_v54 = vpop.permute.xlu2 %466 }
  0xcc   :  { %v369_v49 = vpop.permute.xlu1 %368 }
  0xcd   :  { %v372_v50 = vsel %vm370_vm6, %v365_v39, %v369_v49  ;;  %v374_v51 = vsel %vm370_vm6, %v369_v49, %v365_v39 }
  0xce   :  { %v379_v14 = vmul.f32 %v1584_v45, %v372_v50  ;;  %v380_v15 = vmul.f32 %v1587_v46, %v374_v51 }
  0xd0   :  { %v387_v52 = vrot.slane %v379_v14, 4  ;;  %v388_v53 = vrot.slane %v380_v15, 4 }
  0xd2   :  { %395 = vst [vmem:[#allocation2 + $0x8] sm:$0x30] %v387_v52  ;;  %v417_v57 = vpop.permute.xlu0 %416  ;;  %v248_v6 = vpop.permute.xlu2 %247 }
  0xd3   :  { %396 = vst [vmem:[#allocation2 + $0x48] sm:$0x30] %v388_v53  ;;  %v421_v58 = vsel %vm420_vm4, %v413_v44, %v417_v57  ;;  %v423_v59 = vsel %vm420_vm4, %v417_v57, %v413_v44 }
  0xd4   :  { %v367_v60 = vpop.permute.xlu1 %366  ;;  %v427_v61 = vmul.f32 %v1550_v7, %v421_v58  ;;  %v428_v62 = vmul.f32 %v1553_v8, %v423_v59  ;;  %v489_v59 = vld [vmem:[#allocation8] sm:$0xff] }
  0xd5   :  { %v371_v63 = vsel %vm370_vm6, %v363_v47, %v367_v60  ;;  %v373_v2 = vsel %vm370_vm6, %v367_v60, %v363_v47 }
  0xd6   :  { %v377_v3 = vmul.f32 %v1584_v45, %v371_v63  ;;  %v378_v4 = vmul.f32 %v1587_v46, %v373_v2  ;;  %v435_v9 = vrot.slane %v427_v61, 2  ;;  %v436_v10 = vrot.slane %v428_v62, 2  ;;  %v542_v61 = vld [vmem:[#allocation2 + $0x38] sm:$0xff] }
  0xd8   :  { %v385_v11 = vrot.slane %v377_v3, 4  ;;  %v386_v12 = vrot.slane %v378_v4, 4  ;;  %443 = vst [vmem:[#allocation2 + $0x50] sm:$0xc0] %v435_v9 }
  0xd9   :  { %444 = vst [vmem:[#allocation2 + $0x10] sm:$0xc0] %v436_v10  ;;  %v543_v53 = vld [vmem:[#allocation2 + $0x8] sm:$0xff] }
  0xda   :  { %393 = vst [vmem:[#allocation2 + $0x50] sm:$0x30] %v385_v11  ;;  %v465_v17 = vpop.permute.xlu0 %464  ;;  %v544_v57 = vld [vmem:[#allocation2 + $0x48] sm:$0xff] }
  0xdb   :  { %394 = vst [vmem:[#allocation2 + $0x10] sm:$0x30] %v386_v12 }
  0xdc   :  { %v244_v31 = vpop.permute.xlu1 %243 }
  0xdd   :  { %v252_v32 = vsel %vm251_vm3, %v244_v31, %v248_v6  ;;  %v254_v18 = vsel %vm251_vm3, %v248_v6, %v244_v31 }
  0xde   :  { %v258_v19 = vmul.f32 %v1535_v55, %v254_v18  ;;  %v259_v20 = vmul.f32 %v1538_v56, %v252_v32 }
  0xe0   :  { %v266_v21 = vrot.slane %v258_v19, 2  ;;  %v267_v22 = vrot.slane %v259_v20, 2 }
  0xe1   :  { %v492_v10 = vld [vmem:[#allocation2 + $0x50] sm:$0xff] }
  0xe2   :  { %274 = vst [vmem:[#allocation2 + $0x40] sm:$0xc0] %v266_v21  ;;  %v198_v27 = vpop.permute.xlu0 %197  ;;  %v493_v11 = vld [vmem:[#allocation2 + $0x10] sm:$0xff] }
  0xe3   :  { %275 = vst [vmem:[#allocation2] sm:$0xc0] %v267_v22  ;;  %v202_v28 = vsel %vm201_vm2, %v1512_v36, %v198_v27  ;;  %v204_v33 = vsel %vm201_vm2, %v198_v27, %v1512_v36 }
  0xe4   :  { %v469_v34 = vpop.permute.xlu1 %468  ;;  %v208_v35 = vmul.f32 %v1516_v37, %v204_v33  ;;  %v209_v39 = vmul.f32 %v1519_v38, %v202_v28 }
  0xe5   :  { %v472_v40 = vsel %vm470_vm7, %v465_v17, %v469_v34  ;;  %v474_v41 = vsel %vm470_vm7, %v469_v34, %v465_v17 }
  0xe6   :  { %v479_v42 = vmul.f32 %v1618_v25, %v472_v40  ;;  %v480_v43 = vmul.f32 %v1620_v26, %v474_v41  ;;  %v216_v44 = vrot.slane %v208_v35, 4  ;;  %v217_v47 = vrot.slane %v209_v39, 4 }
  0xe8   :  { %483 = vst [vmem:[#allocation2 + $0x30] sm:$0x3] %v479_v42 }
  0xe9   :  { %484 = vst [vmem:[#allocation2 + $0x20] sm:$0x3] %v480_v43 }
  0xea   :  { %224 = vst [vmem:[#allocation2 + $0x40] sm:$0x30] %v216_v44  ;;  %v104_v58 = vpop.permute.xlu0 %103 }
  0xeb   :  { %225 = vst [vmem:[#allocation2] sm:$0x30] %v217_v47 }
  0xec   :  { %v463_v36 = vpop.permute.xlu1 %462 }
  0xed   :  { %v471_v49 = vsel %vm470_vm7, %v463_v36, %v467_v54  ;;  %v473_v50 = vsel %vm470_vm7, %v467_v54, %v463_v36  ;;  %v541_v54 = vld [vmem:[#allocation2 + $0x58] sm:$0xff] }
  0xee   :  { %v477_v51 = vmul.f32 %v1618_v25, %v471_v49  ;;  %v478_v14 = vmul.f32 %v1620_v26, %v473_v50 }
  0xef   :  { %v545_v15 = vld [vmem:[#allocation2 + $0x30] sm:$0xff] }
  0xf0   :  { %481 = vst [vmem:[#allocation2 + $0x18] sm:$0x3] %v477_v51  ;;  %560 = vmatpush.msra.mxu2 %v545_v15  ;;  %v546_v52 = vld [vmem:[#allocation2 + $0x20] sm:$0xff] }
  0xf1   :  { %482 = vst [vmem:[#allocation2 + $0x28] sm:$0x3] %v478_v14  ;;  %580 = vmatpush.msra.mxu3 %v546_v52 }
  0xf2   :  { %941 = vst [vmem:[#allocation2 + $0x30] sm:$0xfc] %v1352_v48  ;;  %561 = vmatpush.msra.mxu2 %v543_v53 }
  0xf3   :  { %942 = vst [vmem:[#allocation2 + $0x20] sm:$0xfc] %v1352_v48  ;;  %581 = vmatpush.msra.mxu3 %v544_v57 }
  0xf4   :  { %v108_v60 = vpop.permute.xlu1 %107  ;;  %562 = vmatpush.msra.mxu2 %v541_v54 }
  0xf5   :  { %v114_v62 = vsel %vm113_vm0, %v104_v58, %v108_v60  ;;  %v116_v63 = vsel %vm113_vm0, %v108_v60, %v104_v58  ;;  %582 = vmatpush.msra.mxu3 %v542_v61  ;;  %1139 = vmatmul.msk.f32.vlgmr.msra.gmra.mxu2 %vm496_vm8, %v489_v59 }
  0xf6   :  { %v120_v2 = vmul.f32 %v1488_v5, %v116_v63  ;;  %v121_v3 = vmul.f32 %v1491_v16, %v114_v62  ;;  %1140 = vmatmul.msk.f32.vlgmr.msra.gmra.mxu3 %vm496_vm8, %v489_v59 }
  0xf7   :  { %v494_v4 = vld [vmem:[#allocation2 + $0x18] sm:$0xff] }
  0xf8   :  { %124 = vst [vmem:[#allocation2 + $0x40] sm:$0x3] %v120_v2  ;;  %513 = vmatpush.msra.mxu0 %v494_v4  ;;  %v495_v9 = vld [vmem:[#allocation2 + $0x28] sm:$0xff] }
  0xf9   :  { %125 = vst [vmem:[#allocation2] sm:$0x3] %v121_v3  ;;  %533 = vmatpush.msra.mxu1 %v495_v9 }
  0xfa   :  { %939 = vst [vmem:[#allocation2 + $0x18] sm:$0xfc] %v1352_v48  ;;  %514 = vmatpush.msra.mxu0 %v492_v10 }
  0xfb   :  { %940 = vst [vmem:[#allocation2 + $0x28] sm:$0xfc] %v1352_v48  ;;  %534 = vmatpush.msra.mxu1 %v493_v11 }
  0xff   :  { %v490_v12 = vld [vmem:[#allocation2 + $0x40] sm:$0xff] }
 0x100   :  { %515 = vmatpush.msra.mxu0 %v490_v12  ;;  %v491_v6 = vld [vmem:[#allocation2] sm:$0xff] }
 0x101   :  { %535 = vmatpush.msra.mxu1 %v491_v6  ;;  %1137 = vmatmul.msk.f32.vlgmr.msra.gmra.mxu0 %vm496_vm8, %v489_v59 }
 0x102   :  { %1138 = vmatmul.msk.f32.vlgmr.msra.gmra.mxu1 %vm496_vm8, %v489_v59 }
 0x178   :  { %v564_v31 = vpop.f32.mrf.mxu2 }
 0x179   :  { %v584_v17 = vpop.f32.mrf.mxu3 }
 0x17a   :  { %v592_v32 = vrot.slane %v584_v17, 4 }
 0x17c   :  { %v595_v18 = vsel %vm593_vm9, %v564_v31, %v592_v32 }
 0x17d   :  { %v1658_v19 = vadd.f32 %v595_v18, %v1403_v0 }
 0x17e   :  { %v517_v20 = vpop.f32.mrf.mxu0 }
 0x17f   :  { %601 = vst [vmem:[#allocation11 + $0x8] sm:$0x33] %v1658_v19  ;;  %v537_v48 = vpop.f32.mrf.mxu1 }
 0x180   :  { %608 = vst [vmem:[#allocation1 + $0x10] ss:$2 sm:$0xff] %v1658_v19  ;;  %v591_v21 = vrot.slane %v537_v48, 4 }
 0x182   :  { %v594_v22 = vsel %vm593_vm9, %v517_v20, %v591_v21 }
 0x183   :  { %v1664_v27 = vadd.f32 %v594_v22, %v1405_v1 }
 0x185   :  { %600 = vst [vmem:[#allocation11] sm:$0x33] %v1664_v27 }
 0x186   :  { %604 = vst [vmem:[#allocation1] ss:$2 sm:$0xff] %v1664_v27 }
 0x187   :  { %v609_v28 = vld.sshfl [vmem:[#allocation1 + $0x10] sm:$0xff pattern:$0x75316420]  ;;  %v610_v33 = vld.sshfl [vmem:[#allocation1 + $0x18] sm:$0xff pattern:$0x75316420] }
 0x188   :  { %617 = vrot.lane.b32.xlu1 %v609_v28, %s1345_s2  ;;  %621 = vrot.lane.b32.xlu2 %v610_v33, %s1345_s2  ;;  %639 = vst [vmem:[#allocation1 + $0x10] ss:$2 sm:$0xff] %v1658_v19 }
 0x18d   :  { %v1671_v34 = vld.sshfl [vmem:[#allocation1] sm:$0xff pattern:$0x75316420]  ;;  %v1673_v35 = vld.sshfl [vmem:[#allocation1 + $0x8] sm:$0xff pattern:$0x75316420] }
 0x18e   :  { %635 = vst [vmem:[#allocation1] ss:$2 sm:$0xff] %v1664_v27 }
 0x18f   :  { %v641_v39 = vld.sshfl [vmem:[#allocation1 + $0x18] sm:$0xff pattern:$0x75316420]  ;;  %v640_v40 = vld.sshfl [vmem:[#allocation1 + $0x10] sm:$0xff pattern:$0x75316420] }
 0x190   :  { %648 = vrot.lane.b32.xlu1 %v640_v40, %s1342_s30  ;;  %682 = vst [vmem:[#allocation1 + $0x10] ss:$2 sm:$0xff] %v1658_v19 }
 0x195   :  { %v637_v41 = vld.sshfl [vmem:[#allocation1 + $0x8] sm:$0xff pattern:$0x75316420]  ;;  %v636_v42 = vld.sshfl [vmem:[#allocation1] sm:$0xff pattern:$0x75316420] }
 0x196   :  { %650 = vrot.lane.b32.xlu0 %v637_v41, %s1342_s30  ;;  %646 = vrot.lane.b32.xlu2 %v636_v42, %s1342_s30  ;;  %678 = vst [vmem:[#allocation1] ss:$2 sm:$0xff] %v1664_v27 }
 0x197   :  { %v684_v43 = vld.sshfl [vmem:[#allocation1 + $0x18] sm:$0xff pattern:$0x75316420]  ;;  %v683_v44 = vld.sshfl [vmem:[#allocation1 + $0x10] sm:$0xff pattern:$0x75316420] }
 0x198   :  { %725 = vst [vmem:[#allocation1 + $0x10] ss:$2 sm:$0xff] %v1658_v19 }
 0x19d   :  { %v1682_v47 = vld.sshfl [vmem:[#allocation1 + $0x8] sm:$0xff pattern:$0x75316420]  ;;  %v679_v36 = vld.sshfl [vmem:[#allocation1] sm:$0xff pattern:$0x75316420] }
 0x19e   :  { %691 = vrot.lane.b32.xlu0 %v683_v44, %s1346_s3  ;;  %652 = vrot.lane.b32.xlu2 %v641_v39, %s1342_s30  ;;  %721 = vst [vmem:[#allocation1] ss:$2 sm:$0xff] %v1664_v27 }
 0x19f   :  { %689 = vrot.lane.b32.xlu1 %v679_v36, %s1346_s3  ;;  %v727_v49 = vld.sshfl [vmem:[#allocation1 + $0x18] sm:$0xff pattern:$0x75316420]  ;;  %v726_v50 = vld.sshfl [vmem:[#allocation1 + $0x10] sm:$0xff pattern:$0x75316420] }
 0x1a0   :  { %768 = vst [vmem:[#allocation1 + $0x10] ss:$2 sm:$0xff] %v1658_v19 }
 0x1a5   :  { %v722_v51 = vld.sshfl [vmem:[#allocation1] sm:$0xff pattern:$0x75316420]  ;;  %v723_v14 = vld.sshfl [vmem:[#allocation1 + $0x8] sm:$0xff pattern:$0x75316420] }
 0x1a6   :  { %764 = vst [vmem:[#allocation1] ss:$2 sm:$0xff] %v1664_v27  ;;  %738 = vrot.lane.b32.xlu0 %v727_v49, %s1347_s15  ;;  %734 = vrot.lane.b32.xlu2 %v726_v50, %s1347_s15 }
 0x1a7   :  { %695 = vrot.lane.b32.xlu1 %v684_v43, %s1346_s3  ;;  %v769_v15 = vld.sshfl [vmem:[#allocation1 + $0x10] sm:$0xff pattern:$0x75316420]  ;;  %v770_v52 = vld.sshfl [vmem:[#allocation1 + $0x18] sm:$0xff pattern:$0x75316420] }
 0x1a8   :  { %783 = vst [vmem:[#allocation1 + $0x10] ss:$2 sm:$0xff] %v1658_v19 }
 0x1a9   :  { %777 = vst [vmem:[#allocation2 + $0x8] sm:$0x3] %v769_v15 }
 0x1aa   :  { %778 = vst [vmem:[#allocation2 + $0x48] sm:$0x3] %v770_v52 }
 0x1ad   :  { %v765_v53 = vld.sshfl [vmem:[#allocation1] sm:$0xff pattern:$0x75316420]  ;;  %v766_v57 = vld.sshfl [vmem:[#allocation1 + $0x8] sm:$0xff pattern:$0x75316420] }
 0x1ae   :  { %779 = vst [vmem:[#allocation1] ss:$2 sm:$0xff] %v1664_v27 }
 0x1af   :  { %v784_v58 = vld.sshfl [vmem:[#allocation1 + $0x10] sm:$0xff pattern:$0x75316420]  ;;  %775 = vst [vmem:[#allocation2 + $0x50] sm:$0x3] %v765_v53 }
 0x1b0   :  { %792 = vrot.lane.b32.xlu2 %v784_v58, %s1348_s16  ;;  %776 = vst [vmem:[#allocation2 + $0x10] sm:$0x3] %v766_v57  ;;  %v785_v54 = vld.sshfl [vmem:[#allocation1 + $0x18] sm:$0xff pattern:$0x75316420] }
 0x1b1   :  { %826 = vst [vmem:[#allocation1 + $0x10] ss:$2 sm:$0xff] %v1658_v19 }
 0x1b5   :  { %v781_v59 = vld.sshfl [vmem:[#allocation1 + $0x8] sm:$0xff pattern:$0x75316420]  ;;  %v780_v60 = vld.sshfl [vmem:[#allocation1] sm:$0xff pattern:$0x75316420] }
 0x1b6   :  { %794 = vrot.lane.b32.xlu1 %v781_v59, %s1348_s16  ;;  %790 = vrot.lane.b32.xlu0 %v780_v60, %s1348_s16  ;;  %822 = vst [vmem:[#allocation1] ss:$2 sm:$0xff] %v1664_v27 }
 0x1b8   :  { %v827_v61 = vld.sshfl [vmem:[#allocation1 + $0x10] sm:$0xff pattern:$0x75316420]  ;;  %v828_v62 = vld.sshfl [vmem:[#allocation1 + $0x18] sm:$0xff pattern:$0x75316420] }
 0x1b9   :  { %869 = vst [vmem:[#allocation1 + $0x10] ss:$2 sm:$0xff] %v1658_v19 }
 0x1bd   :  { %v823_v63 = vld.sshfl [vmem:[#allocation1] sm:$0xff pattern:$0x75316420]  ;;  %v824_v2 = vld.sshfl [vmem:[#allocation1 + $0x8] sm:$0xff pattern:$0x75316420] }
 0x1be   :  { %835 = vrot.lane.b32.xlu1 %v827_v61, %s1349_s17  ;;  %796 = vrot.lane.b32.xlu0 %v785_v54, %s1348_s16  ;;  %865 = vst [vmem:[#allocation1] ss:$2 sm:$0xff] %v1664_v27 }
 0x1bf   :  { %833 = vrot.lane.b32.xlu2 %v823_v63, %s1349_s17 }
 0x1c0   :  { %v870_v3 = vld.sshfl [vmem:[#allocation1 + $0x10] sm:$0xff pattern:$0x75316420]  ;;  %v871_v4 = vld.sshfl [vmem:[#allocation1 + $0x18] sm:$0xff pattern:$0x75316420] }
 0x1c1   :  { %912 = vst [vmem:[#allocation1 + $0x10] ss:$2 sm:$0xff] %v1658_v19 }
 0x1c5   :  { %v866_v9 = vld.sshfl [vmem:[#allocation1] sm:$0xff pattern:$0x75316420]  ;;  %v867_v10 = vld.sshfl [vmem:[#allocation1 + $0x8] sm:$0xff pattern:$0x75316420] }
 0x1c6   :  { %837 = vrot.lane.b32.xlu0 %v824_v2, %s1349_s17  ;;  %876 = vrot.lane.b32.xlu1 %v866_v9, %s1350_s18  ;;  %908 = vst [vmem:[#allocation1] ss:$2 sm:$0xff] %v1664_v27 }
 0x1c7   :  { %839 = vrot.lane.b32.xlu2 %v828_v62, %s1349_s17 }
 0x1c8   :  { %v913_v6 = vld.sshfl [vmem:[#allocation1 + $0x10] sm:$0xff pattern:$0x75316420]  ;;  %v914_v17 = vld.sshfl [vmem:[#allocation1 + $0x18] sm:$0xff pattern:$0x75316420] }
 0x1cd   :  { %v910_v11 = vld.sshfl [vmem:[#allocation1 + $0x8] sm:$0xff pattern:$0x75316420]  ;;  %v909_v12 = vld.sshfl [vmem:[#allocation1] sm:$0xff pattern:$0x75316420] }
 0x1ce   :  { %878 = vrot.lane.b32.xlu0 %v870_v3, %s1350_s18  ;;  %882 = vrot.lane.b32.xlu1 %v871_v4, %s1350_s18 }
 0x1cf   :  { %880 = vrot.lane.b32.xlu2 %v867_v10, %s1350_s18 }
 0x1d6   :  { %923 = vrot.lane.b32.xlu1 %v910_v11, %s1351_s19  ;;  %919 = vrot.lane.b32.xlu0 %v909_v12, %s1351_s19 }
 0x1d7   :  { %921 = vrot.lane.b32.xlu2 %v913_v6, %s1351_s19 }
 0x1de   :  { %736 = vrot.lane.b32.xlu1 %v723_v14, %s1347_s15  ;;  %925 = vrot.lane.b32.xlu0 %v914_v17, %s1351_s19 }
 0x1df   :  { %693 = vrot.lane.b32.xlu2 %v1682_v47, %s1346_s3 }
 0x1e2   :  { %v622_v31 = vpop.permute.xlu2 %621 }
 0x1e6   :  { %732 = vrot.lane.b32.xlu0 %v722_v51, %s1347_s15 }
 0x1e7   :  { %615 = vrot.lane.b32.xlu2 %v1671_v34, %s1345_s2 }
 0x1ee   :  { %619 = vrot.lane.b32.xlu0 %v1673_v35, %s1345_s2 }
 0x1f0   :  { %v647_v32 = vpop.permute.xlu2 %646 }
 0x1f8   :  { %v653_v22 = vpop.permute.xlu2 %652 }
 0x1fa   :  { %v618_v18 = vpop.permute.xlu1 %617 }
 0x1fb   :  { %v624_v19 = vsel %vm113_vm0, %v618_v18, %v622_v31  ;;  %v626_v48 = vsel %vm113_vm0, %v622_v31, %v618_v18 }
 0x1fc   :  { %v629_v20 = vmul.f32 %v626_v48, %v1488_v5  ;;  %v630_v21 = vmul.f32 %v624_v19, %v1491_v16 }
 0x1fe   :  { %633 = vst [vmem:[#allocation2 + $0x58] sm:$0x3] %v629_v20 }
 0x1ff   :  { %634 = vst [vmem:[#allocation2 + $0x38] sm:$0x3] %v630_v21 }
 0x200   :  { %v735_v42 = vpop.permute.xlu2 %734 }
 0x202   :  { %v649_v27 = vpop.permute.xlu1 %648 }
 0x203   :  { %v655_v28 = vsel %vm151_vm1, %v649_v27, %v653_v22  ;;  %v657_v33 = vsel %vm151_vm1, %v653_v22, %v649_v27 }
 0x204   :  { %v660_v34 = vmul.f32 %v657_v33, %v1501_v23  ;;  %v661_v35 = vmul.f32 %v655_v28, %v1504_v24 }
 0x206   :  { %v668_v39 = vrot.slane %v660_v34, 6  ;;  %v669_v40 = vrot.slane %v661_v35, 6 }
 0x208   :  { %676 = vst [vmem:[#allocation2 + $0x58] sm:$0xc] %v668_v39  ;;  %v651_v41 = vpop.permute.xlu0 %650 }
 0x209   :  { %677 = vst [vmem:[#allocation2 + $0x38] sm:$0xc] %v669_v40  ;;  %v654_v43 = vsel %vm151_vm1, %v647_v32, %v651_v41  ;;  %v656_v44 = vsel %vm151_vm1, %v651_v41, %v647_v32 }
 0x20a   :  { %v658_v47 = vmul.f32 %v656_v44, %v1501_v23  ;;  %v659_v36 = vmul.f32 %v654_v43, %v1504_v24  ;;  %v793_v14 = vpop.permute.xlu2 %792 }
 0x20c   :  { %v666_v49 = vrot.slane %v658_v47, 6  ;;  %v667_v50 = vrot.slane %v659_v36, 6 }
 0x20e   :  { %674 = vst [vmem:[#allocation2 + $0x40] sm:$0xc] %v666_v49 }
 0x20f   :  { %675 = vst [vmem:[#allocation2] sm:$0xc] %v667_v50 }
 0x210   :  { %v692_v51 = vpop.permute.xlu0 %691 }
 0x211   :  { %v690_v15 = vpop.permute.xlu1 %689 }
 0x218   :  { %v739_v52 = vpop.permute.xlu0 %738 }
 0x219   :  { %v741_v53 = vsel %vm251_vm3, %v735_v42, %v739_v52  ;;  %v743_v57 = vsel %vm251_vm3, %v739_v52, %v735_v42  ;;  %v696_v58 = vpop.permute.xlu1 %695  ;;  %v834_v54 = vpop.permute.xlu2 %833 }
 0x21a   :  { %v746_v23 = vmul.f32 %v743_v57, %v1535_v55  ;;  %v747_v24 = vmul.f32 %v741_v53, %v1538_v56  ;;  %v698_v59 = vsel %vm201_vm2, %v692_v51, %v696_v58  ;;  %v700_v60 = vsel %vm201_vm2, %v696_v58, %v692_v51 }
 0x21b   :  { %v703_v61 = vmul.f32 %v700_v60, %v1516_v37  ;;  %v704_v62 = vmul.f32 %v698_v59, %v1519_v38 }
 0x21c   :  { %v754_v63 = vrot.slane %v746_v23, 2  ;;  %v755_v2 = vrot.slane %v747_v24, 2 }
 0x21d   :  { %v711_v3 = vrot.slane %v703_v61, 4  ;;  %v712_v4 = vrot.slane %v704_v62, 4 }
 0x21e   :  { %762 = vst [vmem:[#allocation2 + $0x58] sm:$0xc0] %v754_v63 }
 0x21f   :  { %763 = vst [vmem:[#allocation2 + $0x38] sm:$0xc0] %v755_v2 }
 0x220   :  { %719 = vst [vmem:[#allocation2 + $0x58] sm:$0x30] %v711_v3 }
 0x221   :  { %720 = vst [vmem:[#allocation2 + $0x38] sm:$0x30] %v712_v4  ;;  %v840_v9 = vpop.permute.xlu2 %839 }
 0x228   :  { %v795_v10 = vpop.permute.xlu1 %794  ;;  %v791_v11 = vpop.permute.xlu0 %790 }
 0x229   :  { %v798_v12 = vsel %vm320_vm5, %v791_v11, %v795_v10  ;;  %v800_v6 = vsel %vm320_vm5, %v795_v10, %v791_v11  ;;  %v881_v17 = vpop.permute.xlu2 %880 }
 0x22a   :  { %v802_v31 = vmul.f32 %v798_v12, %v1559_v29  ;;  %v803_v32 = vmul.f32 %v800_v6, %v1562_v30 }
 0x22c   :  { %v810_v18 = vrot.slane %v802_v31, 6  ;;  %v811_v19 = vrot.slane %v803_v32, 6 }
 0x22e   :  { %818 = vst [vmem:[#allocation2 + $0x50] sm:$0xc] %v810_v18 }
 0x22f   :  { %819 = vst [vmem:[#allocation2 + $0x10] sm:$0xc] %v811_v19 }
 0x230   :  { %v836_v48 = vpop.permute.xlu1 %835  ;;  %v797_v20 = vpop.permute.xlu0 %796 }
 0x231   :  { %v842_v21 = vsel %vm370_vm6, %v836_v48, %v840_v9  ;;  %v844_v22 = vsel %vm370_vm6, %v840_v9, %v836_v48  ;;  %v799_v27 = vsel %vm320_vm5, %v793_v14, %v797_v20  ;;  %v801_v28 = vsel %vm320_vm5, %v797_v20, %v793_v14  ;;  %v922_v33 = vpop.permute.xlu2 %921 }
 0x232   :  { %v847_v34 = vmul.f32 %v842_v21, %v1584_v45  ;;  %v848_v35 = vmul.f32 %v844_v22, %v1587_v46  ;;  %v804_v39 = vmul.f32 %v799_v27, %v1559_v29  ;;  %v805_v40 = vmul.f32 %v801_v28, %v1562_v30 }
 0x234   :  { %v855_v41 = vrot.slane %v847_v34, 4  ;;  %v856_v42 = vrot.slane %v848_v35, 4  ;;  %v812_v43 = vrot.slane %v804_v39, 6  ;;  %v813_v44 = vrot.slane %v805_v40, 6 }
 0x236   :  { %863 = vst [vmem:[#allocation2 + $0x8] sm:$0x30] %v855_v41 }
 0x237   :  { %864 = vst [vmem:[#allocation2 + $0x48] sm:$0x30] %v856_v42 }
 0x238   :  { %820 = vst [vmem:[#allocation2 + $0x8] sm:$0xc] %v812_v43  ;;  %v838_v47 = vpop.permute.xlu0 %837  ;;  %v877_v36 = vpop.permute.xlu1 %876 }
 0x239   :  { %821 = vst [vmem:[#allocation2 + $0x48] sm:$0xc] %v813_v44  ;;  %v841_v49 = vsel %vm370_vm6, %v834_v54, %v838_v47  ;;  %v843_v50 = vsel %vm370_vm6, %v838_v47, %v834_v54  ;;  %v694_v51 = vpop.permute.xlu2 %693  ;;  %v884_v29 = vsel %vm420_vm4, %v877_v36, %v881_v17  ;;  %v886_v30 = vsel %vm420_vm4, %v881_v17, %v877_v36  ;;  %v1022_v44 = vld [vmem:[#allocation2 + $0x58] sm:$0xff] }
 0x23a   :  { %v845_v14 = vmul.f32 %v841_v49, %v1584_v45  ;;  %v846_v52 = vmul.f32 %v843_v50, %v1587_v46  ;;  %v697_v53 = vsel %vm201_vm2, %v690_v15, %v694_v51  ;;  %v699_v57 = vsel %vm201_vm2, %v694_v51, %v690_v15  ;;  %v943_v47 = vld [vmem:[#allocation9] sm:$0xff] }
 0x23b   :  { %v701_v58 = vmul.f32 %v699_v57, %v1516_v37  ;;  %v702_v54 = vmul.f32 %v697_v53, %v1519_v38  ;;  %v888_v23 = vmul.f32 %v884_v29, %v1550_v7  ;;  %v889_v24 = vmul.f32 %v886_v30, %v1553_v8  ;;  %v1023_v49 = vld [vmem:[#allocation2 + $0x38] sm:$0xff] }
 0x23c   :  { %v853_v59 = vrot.slane %v845_v14, 4  ;;  %v854_v60 = vrot.slane %v846_v52, 4 }
 0x23d   :  { %v709_v61 = vrot.slane %v701_v58, 4  ;;  %v710_v45 = vrot.slane %v702_v54, 4  ;;  %v896_v46 = vrot.slane %v888_v23, 2  ;;  %v897_v62 = vrot.slane %v889_v24, 2 }
 0x23e   :  { %861 = vst [vmem:[#allocation2 + $0x50] sm:$0x30] %v853_v59 }
 0x23f   :  { %862 = vst [vmem:[#allocation2 + $0x10] sm:$0x30] %v854_v60 }
 0x240   :  { %717 = vst [vmem:[#allocation2 + $0x40] sm:$0x30] %v709_v61  ;;  %v879_v63 = vpop.permute.xlu0 %878  ;;  %v883_v2 = vpop.permute.xlu1 %882 }
 0x241   :  { %718 = vst [vmem:[#allocation2] sm:$0x30] %v710_v45  ;;  %v885_v37 = vsel %vm420_vm4, %v879_v63, %v883_v2  ;;  %v887_v38 = vsel %vm420_vm4, %v883_v2, %v879_v63  ;;  %v616_v36 = vpop.permute.xlu2 %615 }
 0x242   :  { %904 = vst [vmem:[#allocation2 + $0x50] sm:$0xc0] %v896_v46  ;;  %v890_v15 = vmul.f32 %v885_v37, %v1550_v7  ;;  %v891_v3 = vmul.f32 %v887_v38, %v1553_v8 }
 0x243   :  { %905 = vst [vmem:[#allocation2 + $0x10] sm:$0xc0] %v897_v62 }
 0x244   :  { %v898_v4 = vrot.slane %v890_v15, 2  ;;  %v899_v9 = vrot.slane %v891_v3, 2 }
 0x246   :  { %906 = vst [vmem:[#allocation2 + $0x8] sm:$0xc0] %v898_v4 }
 0x247   :  { %907 = vst [vmem:[#allocation2 + $0x48] sm:$0xc0] %v899_v9 }
 0x248   :  { %v924_v10 = vpop.permute.xlu1 %923  ;;  %v920_v11 = vpop.permute.xlu0 %919 }
 0x249   :  { %v927_v12 = vsel %vm470_vm7, %v920_v11, %v924_v10  ;;  %v929_v6 = vsel %vm470_vm7, %v924_v10, %v920_v11  ;;  %v946_v21 = vld [vmem:[#allocation2 + $0x50] sm:$0xff] }
 0x24a   :  { %v931_v17 = vmul.f32 %v1618_v25, %v927_v12  ;;  %v932_v31 = vmul.f32 %v1620_v26, %v929_v6  ;;  %v947_v22 = vld [vmem:[#allocation2 + $0x10] sm:$0xff] }
 0x24c   :  { %935 = vst [vmem:[#allocation2 + $0x18] sm:$0x3] %v931_v17 }
 0x24d   :  { %936 = vst [vmem:[#allocation2 + $0x28] sm:$0x3] %v932_v31  ;;  %v1024_v42 = vld [vmem:[#allocation2 + $0x8] sm:$0xff] }
 0x24e   :  { %v1025_v43 = vld [vmem:[#allocation2 + $0x48] sm:$0xff] }
 0x250   :  { %v926_v7 = vpop.permute.xlu0 %925  ;;  %v737_v27 = vpop.permute.xlu1 %736 }
 0x251   :  { %v928_v8 = vsel %vm470_vm7, %v922_v33, %v926_v7  ;;  %v930_v32 = vsel %vm470_vm7, %v926_v7, %v922_v33 }
 0x252   :  { %v933_v18 = vmul.f32 %v1618_v25, %v928_v8  ;;  %v934_v19 = vmul.f32 %v1620_v26, %v930_v32 }
 0x253   :  { %v948_v48 = vld [vmem:[#allocation2 + $0x18] sm:$0xff] }
 0x254   :  { %937 = vst [vmem:[#allocation2 + $0x30] sm:$0x3] %v933_v18  ;;  %966 = vmatpush.msrb.mxu0 %v948_v48  ;;  %v949_v20 = vld [vmem:[#allocation2 + $0x28] sm:$0xff] }
 0x255   :  { %938 = vst [vmem:[#allocation2 + $0x20] sm:$0x3] %v934_v19  ;;  %986 = vmatpush.msrb.mxu1 %v949_v20 }
 0x256   :  { %967 = vmatpush.msrb.mxu0 %v946_v21 }
 0x257   :  { %987 = vmatpush.msrb.mxu1 %v947_v22 }
 0x258   :  { %v733_v28 = vpop.permute.xlu0 %732 }
 0x259   :  { %v740_v34 = vsel %vm251_vm3, %v733_v28, %v737_v27  ;;  %v742_v25 = vsel %vm251_vm3, %v737_v27, %v733_v28 }
 0x25a   :  { %v744_v26 = vmul.f32 %v742_v25, %v1535_v55  ;;  %v745_v33 = vmul.f32 %v740_v34, %v1538_v56 }
 0x25b   :  { %v1026_v35 = vld [vmem:[#allocation2 + $0x30] sm:$0xff] }
 0x25c   :  { %v752_v39 = vrot.slane %v744_v26, 2  ;;  %v753_v40 = vrot.slane %v745_v33, 2  ;;  %1041 = vmatpush.msrb.mxu2 %v1026_v35  ;;  %v1027_v41 = vld [vmem:[#allocation2 + $0x20] sm:$0xff] }
 0x25d   :  { %1061 = vmatpush.msrb.mxu3 %v1027_v41 }
 0x25e   :  { %760 = vst [vmem:[#allocation2 + $0x40] sm:$0xc0] %v752_v39  ;;  %1042 = vmatpush.msrb.mxu2 %v1024_v42 }
 0x25f   :  { %761 = vst [vmem:[#allocation2] sm:$0xc0] %v753_v40  ;;  %1062 = vmatpush.msrb.mxu3 %v1025_v43 }
 0x260   :  { %1043 = vmatpush.msrb.mxu2 %v1022_v44  ;;  %v620_v55 = vpop.permute.xlu0 %619 }
 0x261   :  { %1063 = vmatpush.msrb.mxu3 %v1023_v49  ;;  %v623_v56 = vsel %vm113_vm0, %v616_v36, %v620_v55  ;;  %v625_v50 = vsel %vm113_vm0, %v620_v55, %v616_v36  ;;  %1143 = vmatmul.msk.f32.vlgmr.msrb.gmra.mxu2 %vm496_vm8, %v943_v47 }
 0x262   :  { %v627_v51 = vmul.f32 %v625_v50, %v1488_v5  ;;  %v628_v29 = vmul.f32 %v623_v56, %v1491_v16  ;;  %1144 = vmatmul.msk.f32.vlgmr.msrb.gmra.mxu3 %vm496_vm8, %v943_v47 }
 0x264   :  { %631 = vst [vmem:[#allocation2 + $0x40] sm:$0x3] %v627_v51 }
 0x265   :  { %632 = vst [vmem:[#allocation2] sm:$0x3] %v628_v29 }
 0x26b   :  { %v944_v30 = vld [vmem:[#allocation2 + $0x40] sm:$0xff] }
 0x26c   :  { %968 = vmatpush.msrb.mxu0 %v944_v30  ;;  %v945_v14 = vld [vmem:[#allocation2] sm:$0xff] }
 0x26d   :  { %988 = vmatpush.msrb.mxu1 %v945_v14  ;;  %1141 = vmatmul.msk.f32.vlgmr.msrb.gmra.mxu0 %vm496_vm8, %v943_v47 }
 0x26e   :  { %1142 = vmatmul.msk.f32.vlgmr.msrb.gmra.mxu1 %vm496_vm8, %v943_v47 }
 0x2e4   :  { %v1045_v13 = vpop.f32.mrf.mxu2 }
 0x2e5   :  { %v1065_v52 = vpop.f32.mrf.mxu3  ;;  %v1068_v53 = vmul.f32 0.5, %v1045_v13 }
 0x2e6   :  { %v1069_v57 = vmul.f32 0.5, %v1065_v52  ;;  %v1085_v9 = vrot.slane %v1065_v52, 4 }
 0x2e7   :  { %1167 = vtanh.f32 %v1068_v53 }
 0x2e8   :  { %1169 = vtanh.f32 %v1069_v57  ;;  %v1086_v31 = vsel %vm593_vm9, %v1045_v13, %v1085_v9 }
 0x2ea   :  { %v970_v5 = vpop.f32.mrf.mxu0 }
 0x2eb   :  { %v990_v16 = vpop.f32.mrf.mxu1  ;;  %v993_v58 = vmul.f32 0.5, %v970_v5 }
 0x2ec   :  { %v994_v54 = vmul.f32 0.5, %v990_v16  ;;  %v1010_v32 = vrot.slane %v990_v16, 4 }
 0x2ed   :  { %v1168_v23 = vpop.eup %1167  ;;  %1171 = vtanh.f32 %v993_v58 }
 0x2ee   :  { %v1170_v24 = vpop.eup %1169  ;;  %v1072_v59 = vmul.f32 1.442695, %v1168_v23  ;;  %1173 = vtanh.f32 %v994_v54  ;;  %v1011_v20 = vsel %vm593_vm9, %v970_v5, %v1010_v32 }
 0x2ef   :  { %v1074_v60 = vmul.f32 1.442695, %v1170_v24  ;;  %v1093_v61 = vrot.slane %v1170_v24, 6 }
 0x2f0   :  { %1175 = vpow2.f32 %v1072_v59 }
 0x2f1   :  { %1177 = vpow2.f32 %v1074_v60  ;;  %v1094_v45 = vsel %vm1018_vm10, %v1168_v23, %v1093_v61 }
 0x2f2   :  { %1097 = vst [vmem:[#allocation12 + $0x4] sm:$0xf] %v1094_v45 }
 0x2f3   :  { %v1172_v46 = vpop.eup %1171 }
 0x2f4   :  { %v1174_v62 = vpop.eup %1173  ;;  %v997_v63 = vmul.f32 1.442695, %v1172_v46 }
 0x2f5   :  { %v999_v2 = vmul.f32 1.442695, %v1174_v62  ;;  %v1017_v37 = vrot.slane %v1174_v62, 6 }
 0x2f6   :  { %v1176_v38 = vpop.eup %1175  ;;  %1179 = vpow2.f32 %v997_v63 }
 0x2f7   :  { %v1178_v15 = vpop.eup %1177  ;;  %1181 = vpow2.f32 %v999_v2  ;;  %v1019_v3 = vsel %vm1018_vm10, %v1172_v46, %v1017_v37 }
 0x2f8   :  { %v1078_v4 = vrot.slane %v1178_v15, 4  ;;  %1021 = vst [vmem:[#allocation12] sm:$0xf] %v1019_v3 }
 0x2f9   :  { %1123 = dma.vmem_to_hbm [thread:$0]  %s1116_s21, 128, %s1118_s24, [#allocation13], %s1354_s25, %s1354_s25, %s1355_s28  }
 0x2fa   :  { %v1079_v10 = vsel %vm593_vm9, %v1176_v38, %v1078_v4 }
 0x2fb   :  { %v1080_v11 = vrot.slane %v1079_v10, 6 }
 0x2fc   :  { %v1180_v12 = vpop.eup %1179 }
 0x2fd   :  { %v1182_v6 = vpop.eup %1181  ;;  %v1082_v17 = vmul.f32 %v1080_v11, %v1403_v0 }
 0x2fe   :  { %v1003_v7 = vrot.slane %v1182_v6, 4 }
 0x2ff   :  { %v1088_v8 = vadd.f32 %v1086_v31, %v1082_v17 }
 0x300   :  { %v1004_v18 = vsel %vm593_vm9, %v1180_v12, %v1003_v7 }
 0x301   :  { %1090 = vst [vmem:[#allocation11 + $0x8] sm:$0xcc] %v1088_v8  ;;  %v1005_v19 = vrot.slane %v1004_v18, 6 }
 0x303   :  { %v1007_v48 = vmul.f32 %v1005_v19, %v1405_v1 }
 0x305   :  { %v1013_v0 = vadd.f32 %v1011_v20, %v1007_v48 }
 0x307   :  { %1014 = vst [vmem:[#allocation11] sm:$0xcc] %v1013_v0 }
 0x308   :  { %1110 = dma.vmem_to_hbm [thread:$0]  %s1103_s29, 256, %s1105_s6, [#allocation5], %s1338_s26, %s1338_s26, %s1339_s27  }
 0x309   :  { %1333 = dma.done.wait [#allocation5], 256  }
 0x30a   :  { %1334 = vsyncadd [#allocation5], 4294967040 }
 0x30b   :  { %1335 = dma.done.wait [#allocation13], 128  }
 0x30c   :  { %1336 = vsyncadd [#allocation13], 4294967168 }
 0x30d   :  { %1132 = vsyncpa [#allocation4], 1 }
 0x30e   :  { %1133 = vsyncpa [#allocation7], 1 }
 0x30f   :  { %1134 = vsyncpa [#allocation10], 1 }
 0x310   :  { %1135 = vsyncpa [#allocation5], 1 }
 0x311   :  { %1136 = vsyncpa [#allocation13], 1 }

</bundles_post_ra>
